<compile_context>
chip_gen: v7x
topology: tpu7x:2x2x1
jax: 0.10.0
libtpu: 0.0.40
codegen_flags: <defaults>
</compile_context>

<pallas_src>
import jax
import jax.numpy as jnp
from jax.experimental import pallas as pl
from jax.experimental.pallas import tpu as pltpu


# ---------------------------------------------------------------------------
# Fused Pallas kernel: GCN layer 1 + GCN layer 2 + global mean pool + Linear
# ---------------------------------------------------------------------------
def fused_gcn_kernel(flags_ref, pini_ref, pink_ref,          # scalar prefetch (SMEM)
                     a_ref, xw_ref, b1_ref, w2_ref, b2_ref, p_ref,
                     wlin_ref, blin_ref, out_ref,
                     acc_ref, h_ref, pool_ref):
    layer = pl.program_id(0)          # 0: first GCN layer, 1: second GCN layer
    i = pl.program_id(1)              # row tile of A_hat
    k = pl.program_id(2)              # column (reduction) tile of A_hat
    nb = pl.num_programs(2)
    last_i = pl.num_programs(1) - 1
    last_k = nb - 1

    is_l0 = layer == 0
    is_l1 = layer == 1
    nz = flags_ref[i * nb + k] > 0    # this A_hat tile has nonzero entries

    # --- transform stored H1 tile once per column tile, at the start of layer 1
    @pl.when(jnp.logical_and(is_l1, i == 0))
    def _():
        h_ref[k] = jnp.dot(
            h_ref[k], w2_ref[...], preferred_element_type=jnp.float32
        ).astype(h_ref.dtype)

    # --- init accumulators
    @pl.when(k == 0)
    def _():
        acc_ref[...] = jnp.zeros_like(acc_ref)

    @pl.when(jnp.logical_and(is_l1, jnp.logical_and(i == 0, k == 0)))
    def _():
        pool_ref[...] = jnp.zeros_like(pool_ref)

    # --- streamed aggregation over NONZERO tiles only (bf16 MXU, f32 acc);
    #     two predicated dots instead of a jnp.where-selected RHS.
    @pl.when(jnp.logical_and(nz, is_l0))
    def _():
        acc_ref[...] += jnp.dot(
            a_ref[...], xw_ref[...], preferred_element_type=jnp.float32
        )

    @pl.when(jnp.logical_and(nz, is_l1))
    def _():
        acc_ref[...] += jnp.dot(
            a_ref[...], h_ref[k], preferred_element_type=jnp.float32
        )

    # --- finalize a row tile of layer 1: bias + ReLU, park H1 tile in VMEM
    @pl.when(jnp.logical_and(is_l0, k == last_k))
    def _():
        h_ref[i] = jnp.maximum(acc_ref[...] + b1_ref[...], 0.0).astype(h_ref.dtype)

    # --- finalize a row tile of layer 2: bias, then partial mean-pool update
    @pl.when(jnp.logical_and(is_l1, k == last_k))
    def _():
        h2 = acc_ref[...] + b2_ref[...]
        pool_ref[...] += jnp.dot(p_ref[...], h2, preferred_element_type=jnp.float32)

    # --- epilogue: Linear(hidden -> 1) as a lane reduction, written once
    @pl.when(jnp.logical_and(is_l1, jnp.logical_and(i == last_i, k == last_k)))
    def _():
        out = jnp.sum(pool_ref[...] * wlin_ref[...], axis=-1, keepdims=True)
        out_ref[...] = (out + blin_ref[...]).astype(out_ref.dtype)


# ---------------------------------------------------------------------------
# Wrapper: padding, tiling choices, tile-skip schedule, pallas_call
# ---------------------------------------------------------------------------
def _round_up(v, m):
    return ((v + m - 1) // m) * m


def _choose_tile(n):
    # Largest tile up to 512 (mem-bound regime wants big tiles: ~85% of HBM
    # roofline at >=512 vs ~29% at 128), but keep at least two row tiles when
    # the graph is big enough so block-diagonal zero-tile skipping (and a
    # future per-core row split) have something to work with.
    n128 = _round_up(max(n, 1), 128)
    for t in (512, 256, 128):
        if n128 >= 2 * t:
            return t
    for t in (512, 256, 128):
        if t <= n128:
            return t
    return 128


def _pad2(a, rows, cols):
    return jnp.pad(a, ((0, rows - a.shape[0]), (0, cols - a.shape[1])))


def _tile_schedule(a_pad, nb, tile):
    """Per-(i,k)-tile nonzero flags and 'pinned' (last nonzero) block indices.

    Pinning keeps the A_hat block index constant across skipped (all-zero)
    tiles, so the pipeline issues no new DMA for them."""
    a_t = a_pad.reshape(nb, tile, nb, tile)
    flags = (jnp.abs(a_t).sum(axis=(1, 3)) > 0).astype(jnp.int32).reshape(-1)
    idx = jnp.arange(nb * nb, dtype=jnp.int32)
    last_nz = jnp.where(flags > 0, idx, jnp.int32(-1))
    last_nz = jax.lax.cummax(last_nz, axis=0)
    last_nz = jnp.maximum(last_nz, 0)          # leading zero tiles pin to (0,0)
    pin_i = (last_nz // nb).astype(jnp.int32)
    pin_k = (last_nz % nb).astype(jnp.int32)
    return flags, pin_i, pin_k


def _vmem_limit(est_bytes):
    try:
        cap = int(pltpu.get_tpu_info().vmem_capacity_bytes)
    except Exception:
        cap = 64 * 1024 * 1024                 # v7x per-TC: most conservative
    # 2x the estimate for Mosaic-internal scratch, ~25% headroom off physical.
    return int(min(max(2 * est_bytes, 16 * 1024 * 1024), 0.75 * cap))


def pyg_basic_graph_model_forward(params, x, edge_index, batch, num_graphs):
    n, _ = x.shape
    hidden = params["w1"].shape[1]

    a_hat = build_a_hat(edge_index, n)               # f32 [N, N]
    pool_mat = build_pool_matrix(batch, num_graphs)  # f32 [G, N]

    tile = _choose_tile(n)
    n_pad = _round_up(n, tile)
    h_pad = _round_up(hidden, 128)
    g_pad = _round_up(max(num_graphs, 1), 8)
    nb = n_pad // tile

    a_pad_f32 = _pad2(a_hat, n_pad, n_pad)
    flags, pin_i, pin_k = _tile_schedule(a_pad_f32, nb, tile)

    # bf16 streaming operands (f32 accumulation on the MXU inside the kernel).
    a_p = a_pad_f32.astype(jnp.bfloat16)
    # X @ W1 precomputed once in XLA (tiny), streamed as bf16 per column tile.
    xw_p = _pad2((x @ params["w1"]).astype(jnp.float32), n_pad, h_pad).astype(jnp.bfloat16)
    w2_p = _pad2(params["w2"], h_pad, h_pad).astype(jnp.bfloat16)
    b1_p = _pad2(params["b1"].reshape(1, -1), 1, h_pad).astype(jnp.float32)
    b2_p = _pad2(params["b2"].reshape(1, -1), 1, h_pad).astype(jnp.float32)
    p_p = _pad2(pool_mat, g_pad, n_pad).astype(jnp.float32)
    wlin_p = _pad2(params["w_lin"].T, 1, h_pad).astype(jnp.float32)   # [1, h_pad]
    blin_p = params["b_lin"].reshape(1, 1).astype(jnp.float32)

    # VMEM budget: double-buffered input streams + persistent scratch.
    vmem_bytes = (
        2 * tile * tile * 2            # A_hat tile (bf16)
        + 2 * tile * h_pad * 2         # X@W1 tile (bf16)
        + 2 * g_pad * tile * 4         # P tile (f32)
        + 2 * h_pad * h_pad * 2        # W2 resident
        + 2 * 3 * h_pad * 4            # b1, b2, w_lin
        + 2 * (1 + g_pad) * 4          # b_lin + output block
        + tile * h_pad * 4             # f32 row-tile accumulator
        + nb * tile * h_pad * 2        # H1 / H1@W2 block scratch (bf16)
        + g_pad * h_pad * 4            # pooled accumulator
    )

    # Index maps (scalar-prefetch refs are passed positionally after grid idx).
    def a_map(l, i, k, flags_r, pin_i_r, pin_k_r):
        t = i * nb + k
        return (pin_i_r[t], pin_k_r[t])            # pinned: no DMA for zero tiles

    def xw_map(l, i, k, flags_r, pin_i_r, pin_k_r):
        t = i * nb + k
        return (pin_k_r[t] * (1 - l), 0)            # follows pin_k in L0, const in L1

    def p_map(l, i, k, flags_r, pin_i_r, pin_k_r):
        return (0, i * l)                           # const in L0, per-row-tile in L1

    def const_map(l, i, k, flags_r, pin_i_r, pin_k_r):
        return (0, 0)

    out = pl.pallas_call(
        fused_gcn_kernel,
        out_shape=jax.ShapeDtypeStruct((g_pad, 1), jnp.float32),
        grid_spec=pltpu.PrefetchScalarGridSpec(
            num_scalar_prefetch=3,
            grid=(2, nb, nb),
            in_specs=[
                pl.BlockSpec((tile, tile), a_map),      # A_hat
                pl.BlockSpec((tile, h_pad), xw_map),    # X @ W1
                pl.BlockSpec((1, h_pad), const_map),    # b1
                pl.BlockSpec((h_pad, h_pad), const_map),  # W2
                pl.BlockSpec((1, h_pad), const_map),    # b2
                pl.BlockSpec((g_pad, tile), p_map),     # P (mean-pool matrix)
                pl.BlockSpec((1, h_pad), const_map),    # w_lin^T
                pl.BlockSpec((1, 1), const_map),        # b_lin
            ],
            out_specs=pl.BlockSpec((g_pad, 1), const_map),
            scratch_shapes=[
                pltpu.VMEM((tile, h_pad), jnp.float32),        # row-tile accumulator
                pltpu.VMEM((nb, tile, h_pad), jnp.bfloat16),   # H1 / H1@W2 blocks
                pltpu.VMEM((g_pad, h_pad), jnp.float32),       # pooled accumulator
            ],
        ),
        compiler_params=pltpu.CompilerParams(
            # Shared h_ref/pool_ref scratch forces all-'arbitrary' in the fused
            # design (see v7x TODO at the top for the two-call 'parallel' split).
            dimension_semantics=("arbitrary", "arbitrary", "arbitrary"),
            vmem_limit_bytes=_vmem_limit(vmem_bytes),
        ),
    )(flags, pin_i, pin_k, a_p, xw_p, b1_p, w2_p, b2_p, p_p, wlin_p, blin_p)

    return out[:num_graphs]


# ---------------------------------------------------------------------------
# Glue: dense normalized adjacency and pooling matrix (plain JAX)
# ---------------------------------------------------------------------------
def build_a_hat(edge_index, num_nodes):
    """D^{-1/2} (A + I) D^{-1/2} as a dense [N, N] f32 matrix."""
    src, dst = edge_index[0], edge_index[1]
    a = jnp.zeros((num_nodes, num_nodes), jnp.float32)
    # Binary adjacency: duplicate edges collapse to weight 1 (matches GCN on a
    # simple graph; differs from PyG's add-based gcn_norm only under duplicates).
    a = a.at[dst, src].set(1.0)                       # message flows src -> dst
    a = a + jnp.eye(num_nodes, dtype=jnp.float32)     # self loops
    deg = jnp.sum(a, axis=1)
    d_inv_sqrt = jnp.where(deg > 0, 1.0 / jnp.sqrt(deg), 0.0)
    return a * d_inv_sqrt[:, None] * d_inv_sqrt[None, :]


def build_pool_matrix(batch, num_graphs):
    """P[g, i] = 1/|V_g| if node i belongs to graph g, else 0."""
    one_hot = jax.nn.one_hot(batch, num_graphs, dtype=jnp.float32)  # [N, G]
    counts = jnp.maximum(jnp.sum(one_hot, axis=0), 1.0)             # [G]
    return (one_hot / counts[None, :]).T                            # [G, N]


# ---------------------------------------------------------------------------
# Pure-JAX f32 reference (sanity check)
# ---------------------------------------------------------------------------
def reference_forward(params, x, edge_index, batch, num_graphs):
    a_hat = build_a_hat(edge_index, x.shape[0])
    pool_mat = build_pool_matrix(batch, num_graphs)
    h = jnp.maximum(a_hat @ (x @ params["w1"]) + params["b1"], 0.0)
    h = a_hat @ (h @ params["w2"]) + params["b2"]
    pooled = pool_mat @ h
    return pooled @ params["w_lin"] + params["b_lin"]


# ---------------------------------------------------------------------------
if __name__ == "__main__":
    key = jax.random.PRNGKey(0)
    k_x, k_w1, k_w2, k_wl = jax.random.split(key, 4)

    # Two ring graphs of 256 nodes each -> n_pad = 512, tile = 256, nb = 2;
    # the off-diagonal A_hat tiles are all-zero, exercising the tile-skip path.
    nodes_per_graph = 256
    num_graphs = 2
    num_nodes = nodes_per_graph * num_graphs
    in_channels = 8
    hidden_channels = 32

    params = {
        "w1": jax.random.normal(k_w1, (in_channels, hidden_channels), jnp.float32)
        * (1.0 / jnp.sqrt(in_channels)),
        "b1": jnp.zeros((hidden_channels,), jnp.float32),
        "w2": jax.random.normal(k_w2, (hidden_channels, hidden_channels), jnp.float32)
        * (1.0 / jnp.sqrt(hidden_channels)),
        "b2": jnp.zeros((hidden_channels,), jnp.float32),
        "w_lin": jax.random.normal(k_wl, (hidden_channels, 1), jnp.float32)
        * (1.0 / jnp.sqrt(hidden_channels)),
        "b_lin": jnp.zeros((1,), jnp.float32),
    }

    x = jax.random.normal(k_x, (num_nodes, in_channels), jnp.float32)

    def ring_edges(offset, n):
        s = jnp.arange(n, dtype=jnp.int32) + offset
        d = (jnp.arange(n, dtype=jnp.int32) + 1) % n + offset
        return jnp.stack([jnp.concatenate([s, d]), jnp.concatenate([d, s])], axis=0)

    edge_index = jnp.concatenate(
        [ring_edges(g * nodes_per_graph, nodes_per_graph) for g in range(num_graphs)],
        axis=1,
    ).astype(jnp.int32)                                             # [2, E]

    batch = jnp.repeat(
        jnp.arange(num_graphs, dtype=jnp.int32), nodes_per_graph
    )                                                               # [N]

    out = pyg_basic_graph_model_forward(params, x, edge_index, batch, num_graphs)
    out = jax.block_until_ready(out)

    ref = reference_forward(params, x, edge_index, batch, num_graphs)
    assert out.shape == (num_graphs, 1)
    # bf16 streaming operands with f32 accumulation -> slightly loose tolerance.
    assert jnp.allclose(out, ref, atol=5e-2, rtol=5e-2), (out, ref)

    print("KERNEL_OK")
</pallas_src>

<mosaic_0001>
module attributes {stable_mosaic.version = 11 : i64} {
  func.func @fused_gcn_kernel(%arg0: i32, %arg1: i32, %arg2: i32, %arg3: memref<4xi32, #tpu.memory_space<smem>>, %arg4: memref<4xi32, #tpu.memory_space<smem>>, %arg5: memref<4xi32, #tpu.memory_space<smem>>, %arg6: memref<256x256xbf16, #tpu.memory_space<vmem>>, %arg7: memref<256x128xbf16, #tpu.memory_space<vmem>>, %arg8: memref<1x128xf32, #tpu.memory_space<vmem>>, %arg9: memref<128x128xbf16, #tpu.memory_space<vmem>>, %arg10: memref<1x128xf32, #tpu.memory_space<vmem>>, %arg11: memref<8x256xf32, #tpu.memory_space<vmem>>, %arg12: memref<1x128xf32, #tpu.memory_space<vmem>>, %arg13: memref<1x1xf32, #tpu.memory_space<vmem>>, %arg14: memref<8x1xf32, #tpu.memory_space<vmem>>, %arg15: memref<256x128xf32, #tpu.memory_space<vmem>>, %arg16: memref<2x256x128xbf16, #tpu.memory_space<vmem>>, %arg17: memref<8x128xf32, #tpu.memory_space<vmem>>) attributes {dimension_semantics = [#tpu.dimension_semantics<arbitrary>, #tpu.dimension_semantics<arbitrary>, #tpu.dimension_semantics<arbitrary>], iteration_bounds = array<i64: 2, 2, 2>, scalar_prefetch = 3 : i64, scratch_operands = 3 : i64, tpu.core_type = #tpu.core_type<tc>, window_params = [{transform_indices = @transform_0, window_bounds = array<i64: 256, 256>}, {transform_indices = @transform_1, window_bounds = array<i64: 256, 128>}, {pipeline_mode = #tpu.pipeline_mode<synchronous>, transform_indices = @transform_2, window_bounds = array<i64: 1, 128>}, {pipeline_mode = #tpu.pipeline_mode<synchronous>, transform_indices = @transform_3, window_bounds = array<i64: 128, 128>}, {pipeline_mode = #tpu.pipeline_mode<synchronous>, transform_indices = @transform_4, window_bounds = array<i64: 1, 128>}, {transform_indices = @transform_5, window_bounds = array<i64: 8, 256>}, {pipeline_mode = #tpu.pipeline_mode<synchronous>, transform_indices = @transform_6, window_bounds = array<i64: 1, 128>}, {pipeline_mode = #tpu.pipeline_mode<synchronous>, transform_indices = @transform_7, window_bounds = array<i64: 1, 1>}, {pipeline_mode = #tpu.pipeline_mode<synchronous>, transform_indices = @transform_8, window_bounds = array<i64: 8, 1>}]} {
    %c0_i32 = arith.constant 0 : i32
    %0 = arith.cmpi eq, %arg0, %c0_i32 : i32
    %c1_i32 = arith.constant 1 : i32
    %1 = arith.cmpi eq, %arg0, %c1_i32 : i32
    %c2_i32 = arith.constant 2 : i32
    %2 = arith.muli %arg1, %c2_i32 : i32
    %3 = arith.addi %2, %arg2 : i32
    %4 = arith.index_cast %3 : i32 to index
    %5 = memref.load %arg3[%4] : memref<4xi32, #tpu.memory_space<smem>>
    %c0_i32_0 = arith.constant 0 : i32
    %6 = arith.cmpi sgt, %5, %c0_i32_0 : i32
    %c0_i32_1 = arith.constant 0 : i32
    %7 = arith.cmpi eq, %arg1, %c0_i32_1 : i32
    %8 = arith.andi %1, %7 : i1
    %9 = arith.extui %8 : i1 to i32
    %c0_i32_2 = arith.constant 0 : i32
    %10 = arith.cmpi ne, %9, %c0_i32_2 : i32
    scf.if %10 {
      %40 = arith.index_cast %arg2 : i32 to index
      %c0 = arith.constant 0 : index
      %c0_17 = arith.constant 0 : index
      %41 = vector.load %arg16[%40, %c0, %c0_17] : memref<2x256x128xbf16, #tpu.memory_space<vmem>>, vector<1x256x128xbf16>
      %42 = vector.shape_cast %41 : vector<1x256x128xbf16> to vector<256x128xbf16>
      %c0_18 = arith.constant 0 : index
      %c0_19 = arith.constant 0 : index
      %43 = vector.load %arg9[%c0_18, %c0_19] : memref<128x128xbf16, #tpu.memory_space<vmem>>, vector<128x128xbf16>
      %cst = arith.constant dense<0.000000e+00> : vector<256x128xf32>
      %44 = tpu.matmul %42, %43, %cst {dimension_numbers = #tpu.dot_dimension_numbers<[1], [0], [0], [1], [0, 0, 1, 1], [], []>} : vector<256x128xbf16>, vector<128x128xbf16>, vector<256x128xf32> -> vector<256x128xf32>
      %45 = arith.truncf %44 : vector<256x128xf32> to vector<256x128xbf16>
      %46 = arith.index_cast %arg2 : i32 to index
      %c0_20 = arith.constant 0 : index
      %c0_21 = arith.constant 0 : index
      %47 = vector.load %arg16[%46, %c0_20, %c0_21] : memref<2x256x128xbf16, #tpu.memory_space<vmem>>, vector<1x256x128xbf16>
      %48 = vector.shape_cast %47 : vector<1x256x128xbf16> to vector<256x128xbf16>
      %49 = vector.shape_cast %45 : vector<256x128xbf16> to vector<1x256x128xbf16>
      tpu.vector_store %arg16[%46, %c0_20, %c0_21], %49 {strides = array<i32>} : memref<2x256x128xbf16, #tpu.memory_space<vmem>>, vector<1x256x128xbf16>,
    } else {
    }
    %c0_i32_3 = arith.constant 0 : i32
    %11 = arith.cmpi eq, %arg2, %c0_i32_3 : i32
    %12 = arith.extui %11 : i1 to i32
    %c0_i32_4 = arith.constant 0 : i32
    %13 = arith.cmpi ne, %12, %c0_i32_4 : i32
    scf.if %13 {
      %cst = arith.constant 0.000000e+00 : f32
      %40 = vector.broadcast %cst : f32 to vector<256x128xf32>
      %c0 = arith.constant 0 : index
      %c0_17 = arith.constant 0 : index
      %41 = vector.load %arg15[%c0, %c0_17] : memref<256x128xf32, #tpu.memory_space<vmem>>, vector<256x128xf32>
      tpu.vector_store %arg15[%c0, %c0_17], %40 {strides = array<i32>} : memref<256x128xf32, #tpu.memory_space<vmem>>, vector<256x128xf32>,
    } else {
    }
    %c0_i32_5 = arith.constant 0 : i32
    %14 = arith.cmpi eq, %arg1, %c0_i32_5 : i32
    %c0_i32_6 = arith.constant 0 : i32
    %15 = arith.cmpi eq, %arg2, %c0_i32_6 : i32
    %16 = arith.andi %14, %15 : i1
    %17 = arith.andi %1, %16 : i1
    %18 = arith.extui %17 : i1 to i32
    %c0_i32_7 = arith.constant 0 : i32
    %19 = arith.cmpi ne, %18, %c0_i32_7 : i32
    scf.if %19 {
      %cst = arith.constant 0.000000e+00 : f32
      %40 = vector.broadcast %cst : f32 to vector<8x128xf32>
      %c0 = arith.constant 0 : index
      %c0_17 = arith.constant 0 : index
      %41 = vector.load %arg17[%c0, %c0_17] : memref<8x128xf32, #tpu.memory_space<vmem>>, vector<8x128xf32>
      tpu.vector_store %arg17[%c0, %c0_17], %40 {strides = array<i32>} : memref<8x128xf32, #tpu.memory_space<vmem>>, vector<8x128xf32>,
    } else {
    }
    %20 = arith.andi %6, %0 : i1
    %21 = arith.extui %20 : i1 to i32
    %c0_i32_8 = arith.constant 0 : i32
    %22 = arith.cmpi ne, %21, %c0_i32_8 : i32
    scf.if %22 {
      %c0 = arith.constant 0 : index
      %c0_17 = arith.constant 0 : index
      %40 = vector.load %arg15[%c0, %c0_17] : memref<256x128xf32, #tpu.memory_space<vmem>>, vector<256x128xf32>
      %c0_18 = arith.constant 0 : index
      %c0_19 = arith.constant 0 : index
      %41 = vector.load %arg6[%c0_18, %c0_19] : memref<256x256xbf16, #tpu.memory_space<vmem>>, vector<256x256xbf16>
      %c0_20 = arith.constant 0 : index
      %c0_21 = arith.constant 0 : index
      %42 = vector.load %arg7[%c0_20, %c0_21] : memref<256x128xbf16, #tpu.memory_space<vmem>>, vector<256x128xbf16>
      %cst = arith.constant dense<0.000000e+00> : vector<256x128xf32>
      %43 = tpu.matmul %41, %42, %cst {dimension_numbers = #tpu.dot_dimension_numbers<[1], [0], [0], [1], [0, 0, 1, 1], [], []>} : vector<256x256xbf16>, vector<256x128xbf16>, vector<256x128xf32> -> vector<256x128xf32>
      %44 = arith.addf %40, %43 : vector<256x128xf32>
      %c0_22 = arith.constant 0 : index
      %c0_23 = arith.constant 0 : index
      %45 = vector.load %arg15[%c0_22, %c0_23] : memref<256x128xf32, #tpu.memory_space<vmem>>, vector<256x128xf32>
      tpu.vector_store %arg15[%c0_22, %c0_23], %44 {strides = array<i32>} : memref<256x128xf32, #tpu.memory_space<vmem>>, vector<256x128xf32>,
    } else {
    }
    %23 = arith.andi %6, %1 : i1
    %24 = arith.extui %23 : i1 to i32
    %c0_i32_9 = arith.constant 0 : i32
    %25 = arith.cmpi ne, %24, %c0_i32_9 : i32
    scf.if %25 {
      %c0 = arith.constant 0 : index
      %c0_17 = arith.constant 0 : index
      %40 = vector.load %arg15[%c0, %c0_17] : memref<256x128xf32, #tpu.memory_space<vmem>>, vector<256x128xf32>
      %c0_18 = arith.constant 0 : index
      %c0_19 = arith.constant 0 : index
      %41 = vector.load %arg6[%c0_18, %c0_19] : memref<256x256xbf16, #tpu.memory_space<vmem>>, vector<256x256xbf16>
      %42 = arith.index_cast %arg2 : i32 to index
      %c0_20 = arith.constant 0 : index
      %c0_21 = arith.constant 0 : index
      %43 = vector.load %arg16[%42, %c0_20, %c0_21] : memref<2x256x128xbf16, #tpu.memory_space<vmem>>, vector<1x256x128xbf16>
      %44 = vector.shape_cast %43 : vector<1x256x128xbf16> to vector<256x128xbf16>
      %cst = arith.constant dense<0.000000e+00> : vector<256x128xf32>
      %45 = tpu.matmul %41, %44, %cst {dimension_numbers = #tpu.dot_dimension_numbers<[1], [0], [0], [1], [0, 0, 1, 1], [], []>} : vector<256x256xbf16>, vector<256x128xbf16>, vector<256x128xf32> -> vector<256x128xf32>
      %46 = arith.addf %40, %45 : vector<256x128xf32>
      %c0_22 = arith.constant 0 : index
      %c0_23 = arith.constant 0 : index
      %47 = vector.load %arg15[%c0_22, %c0_23] : memref<256x128xf32, #tpu.memory_space<vmem>>, vector<256x128xf32>
      tpu.vector_store %arg15[%c0_22, %c0_23], %46 {strides = array<i32>} : memref<256x128xf32, #tpu.memory_space<vmem>>, vector<256x128xf32>,
    } else {
    }
    %c1_i32_10 = arith.constant 1 : i32
    %26 = arith.cmpi eq, %arg2, %c1_i32_10 : i32
    %27 = arith.andi %0, %26 : i1
    %28 = arith.extui %27 : i1 to i32
    %c0_i32_11 = arith.constant 0 : i32
    %29 = arith.cmpi ne, %28, %c0_i32_11 : i32
    scf.if %29 {
      %c0 = arith.constant 0 : index
      %c0_17 = arith.constant 0 : index
      %40 = vector.load %arg15[%c0, %c0_17] : memref<256x128xf32, #tpu.memory_space<vmem>>, vector<256x128xf32>
      %c0_18 = arith.constant 0 : index
      %c0_19 = arith.constant 0 : index
      %41 = vector.load %arg8[%c0_18, %c0_19] : memref<1x128xf32, #tpu.memory_space<vmem>>, vector<1x128xf32>
      %42 = vector.broadcast %41 : vector<1x128xf32> to vector<256x128xf32>
      %43 = arith.addf %40, %42 : vector<256x128xf32>
      %cst = arith.constant 0.000000e+00 : f32
      %44 = vector.broadcast %cst : f32 to vector<256x128xf32>
      %45 = arith.maximumf %43, %44 : vector<256x128xf32>
      %46 = arith.truncf %45 : vector<256x128xf32> to vector<256x128xbf16>
      %47 = arith.index_cast %arg1 : i32 to index
      %c0_20 = arith.constant 0 : index
      %c0_21 = arith.constant 0 : index
      %48 = vector.load %arg16[%47, %c0_20, %c0_21] : memref<2x256x128xbf16, #tpu.memory_space<vmem>>, vector<1x256x128xbf16>
      %49 = vector.shape_cast %48 : vector<1x256x128xbf16> to vector<256x128xbf16>
      %50 = vector.shape_cast %46 : vector<256x128xbf16> to vector<1x256x128xbf16>
      tpu.vector_store %arg16[%47, %c0_20, %c0_21], %50 {strides = array<i32>} : memref<2x256x128xbf16, #tpu.memory_space<vmem>>, vector<1x256x128xbf16>,
    } else {
    }
    %c1_i32_12 = arith.constant 1 : i32
    %30 = arith.cmpi eq, %arg2, %c1_i32_12 : i32
    %31 = arith.andi %1, %30 : i1
    %32 = arith.extui %31 : i1 to i32
    %c0_i32_13 = arith.constant 0 : i32
    %33 = arith.cmpi ne, %32, %c0_i32_13 : i32
    scf.if %33 {
      %c0 = arith.constant 0 : index
      %c0_17 = arith.constant 0 : index
      %40 = vector.load %arg15[%c0, %c0_17] : memref<256x128xf32, #tpu.memory_space<vmem>>, vector<256x128xf32>
      %c0_18 = arith.constant 0 : index
      %c0_19 = arith.constant 0 : index
      %41 = vector.load %arg10[%c0_18, %c0_19] : memref<1x128xf32, #tpu.memory_space<vmem>>, vector<1x128xf32>
      %42 = vector.broadcast %41 : vector<1x128xf32> to vector<256x128xf32>
      %43 = arith.addf %40, %42 : vector<256x128xf32>
      %c0_20 = arith.constant 0 : index
      %c0_21 = arith.constant 0 : index
      %44 = vector.load %arg17[%c0_20, %c0_21] : memref<8x128xf32, #tpu.memory_space<vmem>>, vector<8x128xf32>
      %c0_22 = arith.constant 0 : index
      %c0_23 = arith.constant 0 : index
      %45 = vector.load %arg11[%c0_22, %c0_23] : memref<8x256xf32, #tpu.memory_space<vmem>>, vector<8x256xf32>
      %cst = arith.constant dense<0.000000e+00> : vector<8x128xf32>
      %46 = tpu.matmul %45, %43, %cst {dimension_numbers = #tpu.dot_dimension_numbers<[1], [0], [0], [1], [0, 0, 1, 1], [], []>} : vector<8x256xf32>, vector<256x128xf32>, vector<8x128xf32> -> vector<8x128xf32>
      %47 = arith.addf %44, %46 : vector<8x128xf32>
      %c0_24 = arith.constant 0 : index
      %c0_25 = arith.constant 0 : index
      %48 = vector.load %arg17[%c0_24, %c0_25] : memref<8x128xf32, #tpu.memory_space<vmem>>, vector<8x128xf32>
      tpu.vector_store %arg17[%c0_24, %c0_25], %47 {strides = array<i32>} : memref<8x128xf32, #tpu.memory_space<vmem>>, vector<8x128xf32>,
    } else {
    }
    %c1_i32_14 = arith.constant 1 : i32
    %34 = arith.cmpi eq, %arg1, %c1_i32_14 : i32
    %c1_i32_15 = arith.constant 1 : i32
    %35 = arith.cmpi eq, %arg2, %c1_i32_15 : i32
    %36 = arith.andi %34, %35 : i1
    %37 = arith.andi %1, %36 : i1
    %38 = arith.extui %37 : i1 to i32
    %c0_i32_16 = arith.constant 0 : i32
    %39 = arith.cmpi ne, %38, %c0_i32_16 : i32
    scf.if %39 {
      %c0 = arith.constant 0 : index
      %c0_17 = arith.constant 0 : index
      %40 = vector.load %arg17[%c0, %c0_17] : memref<8x128xf32, #tpu.memory_space<vmem>>, vector<8x128xf32>
      %c0_18 = arith.constant 0 : index
      %c0_19 = arith.constant 0 : index
      %41 = vector.load %arg12[%c0_18, %c0_19] : memref<1x128xf32, #tpu.memory_space<vmem>>, vector<1x128xf32>
      %42 = vector.broadcast %41 : vector<1x128xf32> to vector<8x128xf32>
      %43 = arith.mulf %40, %42 : vector<8x128xf32>
      %cst = arith.constant dense<0.000000e+00> : vector<8xf32>
      %44 = vector.multi_reduction <add>, %43, %cst [1] : vector<8x128xf32> to vector<8xf32>
      %45 = vector.shape_cast %44 : vector<8xf32> to vector<8x1xf32>
      %c0_20 = arith.constant 0 : index
      %c0_21 = arith.constant 0 : index
      %46 = vector.load %arg13[%c0_20, %c0_21] : memref<1x1xf32, #tpu.memory_space<vmem>>, vector<1x1xf32>
      %47 = vector.broadcast %46 : vector<1x1xf32> to vector<8x1xf32>
      %48 = arith.addf %45, %47 : vector<8x1xf32>
      %c0_22 = arith.constant 0 : index
      %c0_23 = arith.constant 0 : index
      %49 = vector.load %arg14[%c0_22, %c0_23] : memref<8x1xf32, #tpu.memory_space<vmem>>, vector<8x1xf32>
      tpu.vector_store %arg14[%c0_22, %c0_23], %48 {strides = array<i32>} : memref<8x1xf32, #tpu.memory_space<vmem>>, vector<8x1xf32>,
    } else {
    }
    return
  }
  func.func @transform_0(%arg0: i32, %arg1: i32, %arg2: i32, %arg3: memref<4xi32, #tpu.memory_space<smem>>, %arg4: memref<4xi32, #tpu.memory_space<smem>>, %arg5: memref<4xi32, #tpu.memory_space<smem>>) -> (i32, i32) {
    %c2_i32 = arith.constant 2 : i32
    %0 = arith.muli %arg1, %c2_i32 : i32
    %1 = arith.addi %0, %arg2 : i32
    %2 = arith.index_cast %1 : i32 to index
    %3 = memref.load %arg4[%2] : memref<4xi32, #tpu.memory_space<smem>>
    %4 = arith.index_cast %1 : i32 to index
    %5 = memref.load %arg5[%4] : memref<4xi32, #tpu.memory_space<smem>>
    %c0_i32 = arith.constant 0 : i32
    return %3, %5 : i32, i32
  }
  func.func @transform_1(%arg0: i32, %arg1: i32, %arg2: i32, %arg3: memref<4xi32, #tpu.memory_space<smem>>, %arg4: memref<4xi32, #tpu.memory_space<smem>>, %arg5: memref<4xi32, #tpu.memory_space<smem>>) -> (i32, i32) {
    %c2_i32 = arith.constant 2 : i32
    %0 = arith.muli %arg1, %c2_i32 : i32
    %1 = arith.addi %0, %arg2 : i32
    %2 = arith.index_cast %1 : i32 to index
    %3 = memref.load %arg5[%2] : memref<4xi32, #tpu.memory_space<smem>>
    %c1_i32 = arith.constant 1 : i32
    %4 = arith.subi %c1_i32, %arg0 : i32
    %5 = arith.muli %3, %4 : i32
    %c0_i32 = arith.constant 0 : i32
    %c0_i32_0 = arith.constant 0 : i32
    return %5, %c0_i32 : i32, i32
  }
  func.func @transform_2(%arg0: i32, %arg1: i32, %arg2: i32, %arg3: memref<4xi32, #tpu.memory_space<smem>>, %arg4: memref<4xi32, #tpu.memory_space<smem>>, %arg5: memref<4xi32, #tpu.memory_space<smem>>) -> (i32, i32) {
    %c0_i32 = arith.constant 0 : i32
    %c0_i32_0 = arith.constant 0 : i32
    %c0_i32_1 = arith.constant 0 : i32
    return %c0_i32, %c0_i32_0 : i32, i32
  }
  func.func @transform_3(%arg0: i32, %arg1: i32, %arg2: i32, %arg3: memref<4xi32, #tpu.memory_space<smem>>, %arg4: memref<4xi32, #tpu.memory_space<smem>>, %arg5: memref<4xi32, #tpu.memory_space<smem>>) -> (i32, i32) {
    %c0_i32 = arith.constant 0 : i32
    %c0_i32_0 = arith.constant 0 : i32
    %c0_i32_1 = arith.constant 0 : i32
    return %c0_i32, %c0_i32_0 : i32, i32
  }
  func.func @transform_4(%arg0: i32, %arg1: i32, %arg2: i32, %arg3: memref<4xi32, #tpu.memory_space<smem>>, %arg4: memref<4xi32, #tpu.memory_space<smem>>, %arg5: memref<4xi32, #tpu.memory_space<smem>>) -> (i32, i32) {
    %c0_i32 = arith.constant 0 : i32
    %c0_i32_0 = arith.constant 0 : i32
    %c0_i32_1 = arith.constant 0 : i32
    return %c0_i32, %c0_i32_0 : i32, i32
  }
  func.func @transform_5(%arg0: i32, %arg1: i32, %arg2: i32, %arg3: memref<4xi32, #tpu.memory_space<smem>>, %arg4: memref<4xi32, #tpu.memory_space<smem>>, %arg5: memref<4xi32, #tpu.memory_space<smem>>) -> (i32, i32) {
    %0 = arith.muli %arg1, %arg0 : i32
    %c0_i32 = arith.constant 0 : i32
    %c0_i32_0 = arith.constant 0 : i32
    return %c0_i32, %0 : i32, i32
  }
  func.func @transform_6(%arg0: i32, %arg1: i32, %arg2: i32, %arg3: memref<4xi32, #tpu.memory_space<smem>>, %arg4: memref<4xi32, #tpu.memory_space<smem>>, %arg5: memref<4xi32, #tpu.memory_space<smem>>) -> (i32, i32) {
    %c0_i32 = arith.constant 0 : i32
    %c0_i32_0 = arith.constant 0 : i32
    %c0_i32_1 = arith.constant 0 : i32
    return %c0_i32, %c0_i32_0 : i32, i32
  }
  func.func @transform_7(%arg0: i32, %arg1: i32, %arg2: i32, %arg3: memref<4xi32, #tpu.memory_space<smem>>, %arg4: memref<4xi32, #tpu.memory_space<smem>>, %arg5: memref<4xi32, #tpu.memory_space<smem>>) -> (i32, i32) {
    %c0_i32 = arith.constant 0 : i32
    %c0_i32_0 = arith.constant 0 : i32
    %c0_i32_1 = arith.constant 0 : i32
    return %c0_i32, %c0_i32_0 : i32, i32
  }
  func.func @transform_8(%arg0: i32, %arg1: i32, %arg2: i32, %arg3: memref<4xi32, #tpu.memory_space<smem>>, %arg4: memref<4xi32, #tpu.memory_space<smem>>, %arg5: memref<4xi32, #tpu.memory_space<smem>>) -> (i32, i32) {
    %c0_i32 = arith.constant 0 : i32
    %c0_i32_0 = arith.constant 0 : i32
    %c0_i32_1 = arith.constant 0 : i32
    return %c0_i32, %c0_i32_0 : i32, i32
  }
}

</mosaic_0001>

<bundles_post_ra>
// kernel: tpu_custom_call.1
= control target key start
LH: loop header
LB: loop body
LE: loop exit
PB: predicated region body
PF: predicated region fallthrough
CT: control target
= control target key end

     0   :  { %s4263_s0 = inlined_call_operand.vmem [shape: s32[4], index: 0, kind: input, shape index: {}]   ;;  %s4264_s3 = inlined_call_operand.hbm [shape: bf16[512,512], index: 3, kind: input, shape index: {}]   ;;  %s4265_s4 = inlined_call_operand.hbm [shape: bf16[512,128], index: 4, kind: input, shape index: {}]   ;;  %s4266_s5 = inlined_call_operand.hbm [shape: f32[1,128], index: 5, kind: input, shape index: {}]   ;;  %s4267_s6 = inlined_call_operand.hbm [shape: bf16[128,128], index: 6, kind: input, shape index: {}]   ;;  %s4268_s7 = inlined_call_operand.hbm [shape: f32[1,128], index: 7, kind: input, shape index: {}]   ;;  %s4269_s8 = inlined_call_operand.vmem [shape: f32[8,512], index: 8, kind: input, shape index: {}]   ;;  %s4270_s9 = inlined_call_operand.vmem [shape: f32[1,128], index: 9, kind: input, shape index: {}]   ;;  %s4271_s11 = inlined_call_operand.vmem [shape: f32[8,1], index: 11, kind: output, shape index: {}]   ;;  %s4272_s1 = inlined_call_operand.vmem [shape: s32[4], index: 1, kind: input, shape index: {}]   ;;  %s4273_s10 = inlined_call_operand.<no memory space> [shape: f32[1,1], index: 10, kind: input, shape index: {}]   ;;  %s4274_s2 = inlined_call_operand.hbm [shape: s32[4], index: 2, kind: input, shape index: {}]  }
   0x1   :  { %4300 = sst [smem:[#allocation39_spill]] %s4266_s5  ;;  %s16_s19 = sshll.u32 %s4263_s0, 4  ;;  %v26_v0 = vstv %s4273_s10  ;;  %s17_s19 = int_to_ptr.vmem [resolvable:$true] %s16_s19 }
   0x2   :  { %4301 = sst [smem:[#allocation40_spill]] %s4267_s6  ;;  %s20_s22 = sshll.u32 %s4272_s1, 4  ;;  %27 = vst [vmem:[#allocation9] sm:$0x1] %v26_v0  ;;  %s21_s22 = int_to_ptr.vmem [resolvable:$true] %s20_s22 }
   0x3   :  { %4302 = sst [smem:[#allocation41_spill]] %s4268_s7  ;;  %s3168_s25 = scalar_lea.vmem %s17_s19, 16 }
   0x4   :  { %4303 = sst [smem:[#allocation42_spill]] %s4269_s8  ;;  %p3169_p0 = scmp.ne.s32.totalorder %s17_s19, %s3168_s25 }
   0x5   :  { %4304 = sst [smem:[#allocation43_spill]] %s4270_s9  ;;  %p3173_p1 = scmp.lt.s32.totalorder %s17_s19, %s17_s19 }
   0x6   :  { %4305 = sst [smem:[#allocation44_spill]] %s4271_s11  ;;  %p3174_p2 = scmp.lt.s32.totalorder %s3168_s25, %s3168_s25 }
   0x8   :  { %p3175_p3 = por %p3174_p2, %p3173_p1 }
   0xa   :  { %p3176_p4 = pnand %p3175_p3, %p3169_p0 }
   0xc   :  { %3179 = shalt.err (!%p3176_p4)  }
   0xd   :  { %s3468_s26 = smov [#allocation6]   ;;  %s3180_s0 = scalar_lea.vmem %s21_s22, 16 }
   0xe   :  { %19 = dma.vmem_to_smem %s17_s19, 16, %s3468_s26, [#allocation5] }
   0xf   :  { %p3181_p5 = scmp.ne.s32.totalorder %s21_s22, %s3180_s0  ;;  %p3185_p6 = scmp.lt.s32.totalorder %s21_s22, %s21_s22 }
  0x10   :  { %p3186_p7 = scmp.lt.s32.totalorder %s3180_s0, %s3180_s0 }
  0x12   :  { %p3187_p8 = por %p3186_p7, %p3185_p6 }
  0x14   :  { %p3188_p9 = pnand %p3187_p8, %p3181_p5 }
  0x16   :  { %3191 = shalt.err (!%p3188_p9)  }
  0x17   :  { %s3469_s1 = smov [#allocation7]   ;;  %s3192_s28 = scalar_lea.hbm %s4274_s2, 16 }
  0x18   :  { %23 = dma.vmem_to_smem %s21_s22, 16, %s3469_s1, [#allocation5] }
  0x19   :  { %p3193_p10 = scmp.ne.s32.totalorder %s4274_s2, %s3192_s28  ;;  %p3196_p11 = scmp.lt.u32.totalorder %s3192_s28, %s4274_s2 }
  0x1b   :  { %p3198_p12 = pnand %p3196_p11, %p3193_p10 }
  0x1d   :  { %3201 = shalt.err (!%p3198_p12)  }
  0x1e   :  { %s3470_s14 = smov [#allocation8]  }
  0x1f   :  { %25 = dma.hbm_to_smem %s4274_s2, 16, %s3470_s14, [#allocation5] }
  0x20   :  { %3398 = dma.done.wait [#allocation5], 48 }
  0x21   :  { %3399 = vsyncadd [#allocation5], 4294967248 }
  0x22   :  { %29 = sfence }
  0x23   :  { %30 = vsyncpa [#allocation11], 0 }
  0x24   :  { %32 = vsyncpa [#allocation11 + $0x1], 0 }
  0x25   :  { %33 = vsyncpa [#allocation13], 0 }
  0x26   :  { %35 = vsyncpa [#allocation13 + $0x1], 0 }
  0x27   :  { %36 = vsyncpa [#allocation16], 0  ;;  %s3564_s17 = smov 0   ;;  %s3566_s18 = smov 0  }
  0x28   :  { %s3568_s19 = smov 0   ;;  %s3570_s20 = smov 0  }
  0x29   :  { %s3572_s21 = smov 0   ;;  %s3574_s22 = smov 0  }
  0x2a   :  { %s3576_s2 = smov 0   ;;  %s3578_s23 = smov 0  }
  0x2b   :  { %s3580_s24 = smov 0   ;;  %s3582_s25 = smov 0  }
  0x2c   :  { %s3584_s26 = smov 0   ;;  %s3586_s0 = smov 0  }
  0x2d   :  { %s3588_s1 = smov 0  }
  0x2e LB: > { %4306 = sst [smem:[#allocation29_spill]] %s3442_s2  ;;  %s4275_s10 = sadd.s32 4294967295, %s3466_s1   ;;  %s3466_s1 = sphi %s3588_s1, %s42_s1   ;;  %s3462_s0 = sphi %s3586_s0, %s4383_s0   ;;  %s3458_s26 = sphi %s3584_s26, %s4374_s26   ;;  %s3454_s25 = sphi %s3582_s25, %s4382_s25   ;;  %s3450_s24 = sphi %s3580_s24, %s4381_s24   ;;  %s3446_s23 = sphi %s3578_s23, %s4372_s23   ;;  %s3442_s2 = sphi %s3576_s2, %s4371_s2   ;;  %s3438_s22 = sphi %s3574_s22, %s4380_s22   ;;  %s3434_s21 = sphi %s3572_s21, %s4379_s21   ;;  %s3430_s20 = sphi %s3570_s20, %s4378_s20   ;;  %s3426_s19 = sphi %s3568_s19, %s4377_s19   ;;  %s3422_s18 = sphi %s3566_s18, %s4376_s18   ;;  %s3418_s17 = sphi %s3564_s17, %s4375_s17  }
  0x2f   : > { %4307 = sst [smem:[#allocation30_spill]] %s3446_s23  ;;  %p91_p13 = scmp.ne.s32.totalorder %s3434_s21, %s3430_s20 }
  0x30   : > { %4308 = sst [smem:[#allocation31_spill]] %s3450_s24  ;;  %p3629_p0 = scmp.eq.s32.totalorder %s4275_s10, 0 }
  0x31   : > { %4309 = sst [smem:[#allocation32_spill]] %s3454_s25  ;;  %p127_p1 = scmp.ne.s32.totalorder %s3422_s18, %s3418_s17 }
  0x32   : > { %4310 = sst [smem:[#allocation33_spill]] %s3458_s26  ;;  %p2338_p2 = scmp.ge.s32.totalorder %s3466_s1, 1 }
  0x33   : > { %s4311_s27 = scalar_select %p3629_p0, 1, 0 }
  0x34   : > { %p292_p3 = scmp.lt.s32.totalorder %s3466_s1, 9  ;;  %p3638_p4 = por %p3629_p0, %p91_p13 }
  0x35   : > { %4312 = sst [smem:[#allocation34_spill]] %s4311_s27  ;;  %p3644_p5 = por %p127_p1, %p3629_p0 }
  0x36   : > { %s4313_s28 = scalar_select %p3638_p4, 1, 0 }
  0x37   : > { %s4315_s29 = scalar_select %p3644_p5, 1, 0 }
  0x38   : > { %4314 = sst [smem:[#allocation35_spill]] %s4313_s28  ;;  %p3648_p6 = pnand %p2338_p2, %p292_p3 }
  0x39   : > { %4316 = sst [smem:[#allocation36_spill]] %s4315_s29  ;;  %s3471_s12 = smov [#allocation14]  }
  0x3a   : > { %s4317_s30 = scalar_select %p3648_p6, 1, 0 }
  0x3b   : > { %p2901_p7 = pneg %p3648_p6  ;;  %s305_s13 = sshll.u32 %s3471_s12, 4  ;;  %s306_s13 = int_to_ptr.vmem [resolvable:$true] %s305_s13 }
  0x3c   : > { %s3472_s15 = smov [#allocation15]   ;;  %s4319_s5 = sld [smem:[#allocation39_spill]] }
  0x3d   : > { %p3656_p8 = pnand %p2901_p7, %p3629_p0  ;;  %s315_s16 = sshll.u32 %s3472_s15, 4  ;;  %s3660_s16 = int_to_ptr.vmem [resolvable:$true] %s315_s16 }
  0x3f   : > { %p3670_p10 = pneg %p3656_p8 }
  0x42   : > { %s3202_s10 = scalar_lea.hbm %s4319_s5, 16 }
  0x43   : > { %p3203_p9 = scmp.ne.s32.totalorder %s4319_s5, %s3202_s10  ;;  %p3209_p13 = scmp.lt.u32.totalorder %s3202_s10, %s4319_s5 }
  0x45   : > { %p3205_p11 = pnand %p3670_p10, %p3203_p9 }
  0x47   : > { %p3206_p12 = pneg %p3205_p11 }
  0x49   : > { %p3211_p1 = pnand %p3209_p13, %p3206_p12 }
  0x4b   : > { %3214 = shalt.err (!%p3211_p1)
}
  0x4c   : > { %s3215_s17 = scalar_lea.vmem %s306_s13, 16  ;;  %s3222_s9 = scalar_lea.vmem %s306_s13, 32 }
  0x4d   : > { %p3216_p2 = scmp.ne.s32.totalorder %s306_s13, %s3215_s17  ;;  %p3223_p0 = scmp.lt.s32.totalorder %s306_s13, %s306_s13 }
  0x4e   : > { %p3224_p5 = scmp.lt.s32.totalorder %s3222_s9, %s3215_s17 }
  0x4f   : > { %p3218_p3 = pnand %p3216_p2, %p3670_p10 }
  0x50   : > { %p3225_p4 = por %p3224_p5, %p3223_p0 }
  0x51   : > { %p3219_p7 = pneg %p3218_p3 }
  0x53   : > { %p3226_p6 = pnand %p3225_p4, %p3219_p7 }
  0x55   : > { %3229 = shalt.err (!%p3226_p6)
}
  0x56   : > { %2904 = dma.hbm_to_vmem [thread:$0]  (!%p3656_p8), %s4319_s5, 16, %s306_s13, [#allocation13]  }
  0x57   : > { %s4321_s6 = sld [smem:[#allocation40_spill]] }
  0x5d   : > { %s3230_s15 = scalar_lea.hbm %s4321_s6, 1024 }
  0x5e   : > { %p3231_p9 = scmp.ne.s32.totalorder %s4321_s6, %s3230_s15  ;;  %p3237_p4 = scmp.lt.u32.totalorder %s3230_s15, %s4321_s6 }
  0x60   : > { %p3233_p11 = pnand %p3231_p9, %p3670_p10 }
  0x62   : > { %p3234_p0 = pneg %p3233_p11 }
  0x64   : > { %p3239_p5 = pnand %p3237_p4, %p3234_p0 }
  0x66   : > { %3242 = shalt.err (!%p3239_p5)
}
  0x67   : > { %s3243_s13 = scalar_lea.vmem %s3660_s16, 1024  ;;  %p3251_p1 = scmp.lt.s32.totalorder %s3660_s16, %s3660_s16 }
  0x68   : > { %p3244_p6 = scmp.ne.s32.totalorder %s3660_s16, %s3243_s13  ;;  %p3252_p2 = scmp.lt.s32.totalorder %s3243_s13, %s3243_s13 }
  0x6a   : > { %p3246_p12 = pnand %p3244_p6, %p3670_p10  ;;  %p3253_p3 = por %p3252_p2, %p3251_p1 }
  0x6c   : > { %p3247_p13 = pneg %p3246_p12 }
  0x6e   : > { %p3254_p7 = pnand %p3253_p3, %p3247_p13 }
  0x70   : > { %3257 = shalt.err (!%p3254_p7)
}
  0x71   : > { %s4288_s2 = smov 64   ;;  %s4289_s24 = smov 4  }
  0x72   : > { %2907 = dma.hbm_to_vmem [thread:$0]  (!%p3656_p8), %s4321_s6, 1024, %s3660_s16, [#allocation16], %s4288_s2, %s4288_s2, %s4289_s24  }
  0x73   : > { %s3475_s8 = smov [#allocation17]   ;;  %s4322_s7 = sld [smem:[#allocation41_spill]] }
  0x74   : > { %s329_s10 = sshll.u32 %s3475_s8, 4  ;;  %s330_s10 = int_to_ptr.vmem [resolvable:$true] %s329_s10 }
  0x79   : > { %s3258_s9 = scalar_lea.hbm %s4322_s7, 16 }
  0x7a   : > { %p3259_p11 = scmp.ne.s32.totalorder %s4322_s7, %s3258_s9  ;;  %p3265_p5 = scmp.lt.u32.totalorder %s3258_s9, %s4322_s7 }
  0x7c   : > { %p3261_p0 = pnand %p3259_p11, %p3670_p10 }
  0x7e   : > { %p3262_p4 = pneg %p3261_p0 }
  0x80   : > { %p3267_p6 = pnand %p3265_p5, %p3262_p4 }
  0x82   : > { %3270 = shalt.err (!%p3267_p6)
}
  0x83   : > { %s3271_s16 = scalar_lea.vmem %s330_s10, 16  ;;  %s3278_s11 = scalar_lea.vmem %s330_s10, 32 }
  0x84   : > { %p3272_p12 = scmp.ne.s32.totalorder %s330_s10, %s3271_s16  ;;  %p3279_p2 = scmp.lt.s32.totalorder %s330_s10, %s330_s10 }
  0x85   : > { %p3280_p3 = scmp.lt.s32.totalorder %s3278_s11, %s3271_s16 }
  0x86   : > { %p3274_p13 = pnand %p3272_p12, %p3670_p10 }
  0x87   : > { %p3281_p7 = por %p3280_p3, %p3279_p2 }
  0x88   : > { %p3275_p1 = pneg %p3274_p13 }
  0x8a   : > { %p3282_p9 = pnand %p3281_p7, %p3275_p1 }
  0x8c   : > { %3285 = shalt.err (!%p3282_p9)
}
  0x8d   : > { %2910 = dma.hbm_to_vmem [thread:$0]  (!%p3656_p8), %s4322_s7, 16, %s330_s10, [#allocation16]  }
  0x8e   : > { %s54_s23 = sadd.s32 1, %s3454_s25  ;;  %s57_s27 = sadd.s32 1, %s3458_s26 }
  0x8f   : > { %p55_p10 = scmp.ge.s32.totalorder %s54_s23, 2  ;;  %s2334_s14 = sshll.u32 %s3458_s26, 1 }
  0x90   : > { %s3735_s12 = sadd.s32 %s3454_s25, %s2334_s14  ;;  %s78_s10 = sadd.s32 1, %s3438_s22 }
  0x91   : > { %s4385_s23 = smov (%p55_p10, %s54_s23), 0  ;;  %s4387_s27 = smov (!%p55_p10, %s57_s27), %s3458_s26 }
  0x92   : > { %4323 = sst [smem:[#allocation37_spill]] %s4385_s23  ;;  %p59_p8 = scmp.ge.s32.totalorder %s4387_s27, 2 }
  0x93   : > { %s67_s8 = sld [smem:[#allocation7 + %s3735_s12]]  ;;  %p85_p9 = scmp.ne.s32.totalorder %s3438_s22, %s3434_s21 }
  0x94   : > { %p4299_p11 = scmp.eq.s32.totalorder %s3466_s1, 0  ;;  %s4290_s15 = sand.u32 1, %s3438_s22  }
  0x95   : > { %s3752_s17 = scalar_select %p59_p8, 0, %s4387_s27  }
  0x96   : > { %s68_s9 = sld [smem:[#allocation8 + %s3735_s12]]  ;;  %p3757_p0 = por %p4299_p11, %p85_p9 }
  0x97   : > { %4324 = sst [smem:[#allocation38_spill]] %s3752_s17  ;;  %s2335_s16 = sshll.u32 %s3752_s17, 1 }
  0x98   : > { %s2343_s11 = sshll.u32 %s4290_s15, 8  ;;  %s70_s5 = sadd.s32 %s2335_s16, %s4385_s23 }
  0x99   : > { %s71_s20 = sld [smem:[#allocation7 + %s70_s5]]  ;;  %p4326_p4 = scmp.lt.s32.totalorder %s3466_s1, 8 }
  0x9a   : > { %s72_s14 = sld [smem:[#allocation8 + %s70_s5]]  ;;  %s350_s23 = scalar_lea.vmem [#allocation10], %s2343_s11 }
  0x9b   : > { %s2885_s2 = scalar_select %p3757_p0, [#allocation7], [#allocation18] }
  0x9c   : > { %s2886_s24 = scalar_select %p3757_p0, %s3735_s12, 0 }
  0x9d   : > { %s4389_s2 = smov (!%p4326_p4, %s2885_s2), [#allocation21]  ;;  %p4327_p5 = pmov %p4326_p4 }
  0x9e   : > { %s2887_s6 = scalar_select %p3757_p0, [#allocation8], [#allocation19] }
  0x9f   : > { %s4391_s24 = smov (!%p4327_p5, %s2886_s24), 0  ;;  %s73_s7 = ssub.s32 %s67_s8, %s71_s20 }
  0xa0   : > { %s74_s15 = ssub.s32 %s68_s9, %s72_s14  ;;  %s353_s17 = sld [smem:[%s4389_s2 + %s4391_s24]] }
  0xa1   : > { %s75_s16 = sor.u32 %s74_s15, %s73_s7  ;;  %s364_s26 = sshll.u32 %s350_s23, 4  ;;  %s3781_s26 = int_to_ptr.vmem [resolvable:$true] %s364_s26 }
  0xa2   : > { %p76_p6 = scmp.eq.s32.totalorder %s75_s16, 0  ;;  %p4328_p12 = pmov %p4326_p4 }
  0xa3   : > { %p4329_p13 = pmov %p4326_p4  ;;  %s61_s15 = sadd.s32 1, %s3462_s0 }
  0xa4   : > { %s4393_s6 = smov (!%p4328_p12, %s2887_s6), [#allocation22]  ;;  %s3793_s9 = sld [smem:[#allocation8 + %s3735_s12]] }
  0xa5   : > { %s3779_s25 = scalar_select %p76_p6, %s3438_s22, %s78_s10  }
  0xa6   : > { %s354_s29 = sld [smem:[%s4393_s6 + %s4391_s24]]  ;;  %p3787_p1 = pnand %p4329_p13, %p3757_p0 }
  0xa7   : > { %s2463_s7 = sshll.u32 %s353_s17, 7  ;;  %s3800_s24 = sld [smem:[#allocation8 + %s70_s5]] }
  0xa8   : > { %s4331_s13 = sand.u32 1, %s3438_s22   ;;  %p3288_p3 = pneg %p3787_p1 }
  0xa9   : > { %s3804_s20 = scalar_lea.sflag [#allocation11], %s4331_s13  ;;  %s3291_s16 = scalar_lea.hbm %s4264_s3, 16384 }
  0xac   : > { %s2346_s2 = sshll.u32 %s354_s29, 1 }
  0xad   : > { %s361_s8 = sadd.s32 %s2463_s7, %s2346_s2 }
  0xae   : > { %s2348_s23 = sshll.u32 %s361_s8, 6 }
  0xaf   : > { %s3798_s6 = scalar_lea.hbm %s4264_s3, %s2348_s23 }
  0xb0   : > { %s3286_s29 = scalar_lea.hbm %s3798_s6, 4096  ;;  %p3292_p9 = scmp.lt.u32.totalorder %s3798_s6, %s4264_s3 }
  0xb1   : > { %p3287_p2 = scmp.ne.s32.totalorder %s3798_s6, %s3286_s29  ;;  %p3293_p0 = scmp.lt.u32.totalorder %s3291_s16, %s3286_s29 }
  0xb2   : > { %p3295_p5 = scmp.lt.u32.totalorder %s3286_s29, %s3798_s6 }
  0xb3   : > { %p3289_p7 = pnand %p3288_p3, %p3287_p2  ;;  %p3294_p4 = por %p3293_p0, %p3292_p9 }
  0xb5   : > { %p3290_p10 = pneg %p3289_p7  ;;  %p3296_p6 = por %p3295_p5, %p3294_p4 }
  0xb7   : > { %p3297_p12 = pnand %p3296_p6, %p3290_p10 }
  0xb9   : > { %3300 = shalt.err (!%p3297_p12)
}
  0xba   : > { %s3301_s5 = scalar_lea.vmem %s3781_s26, 4096  ;;  %s3476_s8 = smov [#allocation10]  }
  0xbb   : > { %p3302_p13 = scmp.ne.s32.totalorder %s3781_s26, %s3301_s5  ;;  %s3306_s23 = sshll.u32 %s3476_s8, 4  ;;  %s3307_s23 = int_to_ptr.vmem [resolvable:$false] %s3306_s23 }
  0xbc   : > { %s3308_s10 = scalar_lea.vmem %s3307_s23, 8192  ;;  %p3309_p11 = scmp.lt.s32.totalorder %s3781_s26, %s3307_s23 }
  0xbd   : > { %p3304_p2 = pnand %p3302_p13, %p3288_p3  ;;  %p3310_p9 = scmp.lt.s32.totalorder %s3308_s10, %s3301_s5 }
  0xbf   : > { %p3305_p7 = pneg %p3304_p2  ;;  %p3311_p0 = por %p3310_p9, %p3309_p11 }
  0xc1   : > { %p3312_p4 = pnand %p3311_p0, %p3305_p7 }
  0xc3   : > { %3315 = shalt.err (!%p3312_p4)
}
  0xc4   : > { %s3477_s11 = smov 256   ;;  %s3478_s13 = smov 128  }
  0xc5   : > { %s3479_s29 = smov 8   ;;  %s4395_s15 = smov (!%p59_p8, %s61_s15), %s3462_s0 }
  0xc6   : > { %2918 = dma.hbm_to_vmem [thread:$0]  (!%p3787_p1), %s3798_s6, 4096, %s3781_s26, %s3804_s20, %s3477_s11, %s3478_s13, %s3479_s29  }
  0xc7   : > { %p121_p11 = scmp.ne.s32.totalorder %s3426_s19, %s3422_s18  ;;  %p63_p3 = scmp.ge.s32.totalorder %s4395_s15, 2 }
  0xc8   : > { %s104_s17 = ssub.s32 1, %s3462_s0  ;;  %p4332_p10 = scmp.eq.s32.totalorder %s3466_s1, 0 }
  0xc9   : > { %s4397_s15 = smov (%p63_p3, %s4395_s15), 0  ;;  %s105_s26 = smul.u32 %s104_s17, %s3793_s9 }
  0xca   : > { %p3842_p5 = por %p121_p11, %p4332_p10  ;;  %s109_s28 = ssub.s32 1, %s4397_s15 }
  0xcb   : > { %s110_s27 = smul.u32 %s109_s28, %s3800_s24  ;;  %s376_s6 = sand.u32 1, %s3426_s19  }
  0xcc   : > { %s2890_s20 = scalar_select %p3842_p5, [#allocation8], [#allocation20] }
  0xcd   : > { %s111_s16 = ssub.s32 %s105_s26, %s110_s27  ;;  %s114_s7 = sadd.s32 1, %s3426_s19 }
  0xce   : > { %p112_p8 = scmp.eq.s32.totalorder %s111_s16, 0  ;;  %s2349_s2 = sshll.u32 %s376_s6, 7 }
  0xcf   : > { %s4399_s12 = smov (!%p3842_p5, %s3735_s12), 0  ;;  %p4334_p1 = scmp.lt.s32.totalorder %s3466_s1, 8 }
  0xd0   : > { %s3859_s5 = scalar_select %p112_p8, %s3426_s19, %s114_s7  }
  0xd1   : > { %s4401_s20 = smov (!%p4334_p1, %s2890_s20), [#allocation23]  ;;  %p4335_p6 = pmov %p4334_p1 }
  0xd2   : > { %p4336_p12 = pmov %p4334_p1  ;;  %s374_s8 = sand.u32 1, %s3466_s1  }
  0xd3   : > { %s4403_s12 = smov (!%p4335_p6, %s4399_s12), 0  ;;  %s378_s23 = scalar_lea.vmem [#allocation12], %s2349_s2 }
  0xd4   : > { %p3869_p13 = pnand %p4336_p12, %p3842_p5  ;;  %s381_s24 = sld [smem:[%s4401_s20 + %s4403_s12]] }
  0xd5   : > { %s390_s10 = sshll.u32 %s378_s23, 4  ;;  %s3881_s14 = scalar_lea.sflag [#allocation13], %s374_s8  ;;  %s3874_s10 = int_to_ptr.vmem [resolvable:$true] %s390_s10 }
  0xd6   : > { %p3318_p7 = pneg %p3869_p13  ;;  %s3321_s6 = scalar_lea.hbm %s4265_s4, 4096 }
  0xda   : > { %s383_s11 = smul.u32 %s381_s24, %s104_s17 }
  0xdc   : > { %s2464_s13 = sshll.u32 %s383_s11, 11 }
  0xdd   : > { %s3879_s28 = scalar_lea.hbm %s4265_s4, %s2464_s13 }
  0xde   : > { %s3316_s27 = scalar_lea.hbm %s3879_s28, 2048  ;;  %p3322_p4 = scmp.lt.u32.totalorder %s3879_s28, %s4265_s4 }
  0xdf   : > { %p3317_p2 = scmp.ne.s32.totalorder %s3879_s28, %s3316_s27  ;;  %p3323_p11 = scmp.lt.u32.totalorder %s3321_s6, %s3316_s27 }
  0xe0   : > { %p3325_p10 = scmp.lt.u32.totalorder %s3316_s27, %s3879_s28 }
  0xe1   : > { %p3319_p9 = pnand %p3318_p7, %p3317_p2  ;;  %p3324_p3 = por %p3323_p11, %p3322_p4 }
  0xe3   : > { %p3320_p0 = pneg %p3319_p9  ;;  %p3326_p5 = por %p3325_p10, %p3324_p3 }
  0xe5   : > { %p3327_p8 = pnand %p3326_p5, %p3320_p0 }
  0xe7   : > { %3330 = shalt.err (!%p3327_p8)
}
  0xe8   : > { %s3331_s7 = scalar_lea.vmem %s3874_s10, 2048  ;;  %s3480_s2 = smov [#allocation12]  }
  0xe9   : > { %p3332_p1 = scmp.ne.s32.totalorder %s3874_s10, %s3331_s7  ;;  %s3336_s24 = sshll.u32 %s3480_s2, 4  ;;  %s3337_s24 = int_to_ptr.vmem [resolvable:$false] %s3336_s24 }
  0xea   : > { %s3338_s8 = scalar_lea.vmem %s3337_s24, 4096  ;;  %p3339_p2 = scmp.lt.s32.totalorder %s3874_s10, %s3337_s24 }
  0xeb   : > { %p3334_p6 = pnand %p3332_p1, %p3318_p7  ;;  %p3340_p9 = scmp.lt.s32.totalorder %s3338_s8, %s3331_s7 }
  0xed   : > { %p3335_p12 = pneg %p3334_p6  ;;  %p3341_p4 = por %p3340_p9, %p3339_p2 }
  0xef   : > { %p3342_p11 = pnand %p3341_p4, %p3335_p12 }
  0xf1   : > { %3345 = shalt.err (!%p3342_p11)
}
  0xf2   : > { %s4338_s23 = smov 4   ;;  %s4339_s11 = smov 64  }
  0xf3   : > { %2923 = dma.hbm_to_vmem [thread:$0]  (!%p3869_p13), %s3879_s28, 2048, %s3874_s10, %s3881_s14, %s4339_s11, %s4339_s11, %s4338_s23  }
  0xf4   : > { %p4340_p7 = scmp.ne.s32.totalorder %s4317_s30, 0 }
  0xf5   : > { %s4341_s13 = sld [smem:[#allocation35_spill]] (!%p4340_p7)  ;;  %s415_s29 = sand.u32 (!%p4340_p7), 1, %s3434_s21  }
  0xf6   : > { %413 = sbr.rel (%p4340_p7) target bundleno = 1687 (0x697), region = 52  ;;  %s2354_s26 = sshll.u32 (!%p4340_p7), %s415_s29, 8 }
  0xf7   : > { %s416_s27 = scalar_lea.sflag (!%p4340_p7), [#allocation11], %s415_s29  ;;  %s3915_s12 = scalar_lea.vmem (!%p4340_p7), [#allocation10], %s2354_s26 }
  0xfb   : > { %p4342_p0 = scmp.ne.s32.totalorder (!%p4340_p7), %s4341_s13, 0 }
  0xfd   : > { %3401 = dma.done.wait (%p4342_p0), %s416_s27, 4096  }
  0xfe   : > { %3403 = vsyncadd (%p4342_p0), %s416_s27, 4294963200  ;;  %s4343_s9 = sadd.s32 4294967295, %s3466_s1   ;;  %s4344_s17 = sld [smem:[#allocation36_spill]] }
  0xff   : > { %s424_s10 = sand.u32 1, %s4343_s9   ;;  %s426_s28 = sand.u32 1, %s3422_s18  }
 0x100   : > { %s2355_s30 = sshll.u32 %s426_s28, 7  ;;  %s425_s14 = scalar_lea.sflag [#allocation13], %s424_s10 }
 0x101   : > { %s3924_s6 = scalar_lea.vmem [#allocation12], %s2355_s30 }
 0x104   : > { %p4345_p13 = scmp.ne.s32.totalorder %s4344_s17, 0 }
 0x106   : > { %3405 = dma.done.wait (%p4345_p13), %s425_s14, 2048  }
 0x107   : > { %3407 = vsyncadd (%p4345_p13), %s425_s14, 4294965248  ;;  %s4346_s20 = sld [smem:[#allocation34_spill]] }
 0x10d   : > { %p4347_p3 = scmp.ne.s32.totalorder %s4346_s20, 0 }
 0x10f   : > { %3409 = dma.done.wait (%p4347_p3), [#allocation13], 16  }
 0x110   : > { %3411 = vsyncadd (%p4347_p3), [#allocation13], 4294967280 }
 0x111   : > { %3413 = dma.done.wait (%p4347_p3), [#allocation16], 1040  }
 0x112   : > { %3415 = vsyncadd (%p4347_p3), [#allocation16], 4294966256  ;;  %s4348_s16 = sld [smem:[#allocation30_spill]]  ;;  %s4349_s7 = sld [smem:[#allocation31_spill]] }
 0x113   : > { %s4350_s2 = sld [smem:[#allocation29_spill]]  ;;  %s4351_s9 = sld [smem:[#allocation42_spill]] }
 0x118   : > { %s2361_s24 = sshll.u32 %s4348_s16, 1  ;;  %s491_s8 = smul.u32 %s4348_s16, %s4349_s7 }
 0x119   : > { %s503_s23 = sadd.s32 %s4350_s2, %s2361_s24  ;;  %p500_p10 = scmp.eq.s32.totalorder %s4349_s7, 0 }
 0x11a   : > { %s3943_s11 = sld [smem:[#allocation6 + %s503_s23]]  ;;  %s2359_s13 = sshll.u32 %s491_s8, 1 }
 0x11b   : > { %p493_p5 = scmp.lt.s32.totalorder %s2359_s13, 3  ;;  %p501_p8 = scmp.eq.s32.totalorder %s4349_s7, 1 }
 0x11c   : > { %p506_p1 = scmp.eq.s32.totalorder %s4348_s16, 0 }
 0x11d   : > { %s4405_s13 = smov (!%p493_p5, %s2359_s13), 3 }
 0x11e   : > { %p507_p6 = pnand %p506_p1, %p501_p8  ;;  %s2360_s29 = sshll.u32 %s4405_s13, 3 }
 0x11f   : > { %s3955_s17 = scalar_lea.vmem %s4351_s9, %s2360_s29  ;;  %v3048_v1 = vld [vmem:[#allocation15] sm:$0xff] (!%p507_p6)   ;;  %s4352_s10 = sld [smem:[#allocation29_spill]] (!%p507_p6)  ;;  %v3049_v2 = vld [vmem:[#allocation15 + $0x8] sm:$0xff] (!%p507_p6)   ;;  %v3050_v3 = vld [vmem:[#allocation15 + $0x10] sm:$0xff] (!%p507_p6)  }
 0x120   : > { %p505_p12 = scmp.gt.s32.totalorder %s3943_s11, 0  ;;  %510 = sbr.rel (%p507_p6) target bundleno = 563 (0x233), region = 76  ;;  %2751 = vmatprep.subr.bf16.mxu0 (!%p507_p6), %v3048_v1  ;;  %2831 = vmatprep.subr.bf16.mxu1 (!%p507_p6), %v3048_v1  ;;  %v3051_v4 = vld [vmem:[#allocation15 + $0x18] sm:$0xff] (!%p507_p6)   ;;  %v3052_v7 = vld [vmem:[#allocation15 + $0x20] sm:$0xff] (!%p507_p6)   ;;  %v3053_v8 = vld [vmem:[#allocation15 + $0x28] sm:$0xff] (!%p507_p6)  }
 0x121   : > { %2752 = vmatpush3.bf16.msra.mxu0 (!%p507_p6), %v3048_v1  ;;  %2839 = vmatpush3.bf16.msra.mxu1 (!%p507_p6), %v3048_v1  ;;  %v3054_v9 = vld [vmem:[#allocation15 + $0x30] sm:$0xff] (!%p507_p6)   ;;  %v3055_v10 = vld [vmem:[#allocation15 + $0x38] sm:$0xff] (!%p507_p6)  }
 0x122   : > { %2753 = vmatprep.subr.bf16.mxu0 (!%p507_p6), %v3049_v2  ;;  %2832 = vmatprep.subr.bf16.mxu1 (!%p507_p6), %v3049_v2 }
 0x125   : > { %s2465_s28 = sshll.u32 (!%p507_p6), %s4352_s10, 7  ;;  %2754 = vmatpush3.bf16.msra.mxu0 (!%p507_p6), %v3049_v2  ;;  %2840 = vmatpush3.bf16.msra.mxu1 (!%p507_p6), %v3049_v2 }
 0x126   : > { %2755 = vmatprep.subr.bf16.mxu0 (!%p507_p6), %v3050_v3  ;;  %2833 = vmatprep.subr.bf16.mxu1 (!%p507_p6), %v3050_v3  ;;  %s3958_s30 = scalar_lea.vmem (!%p507_p6), [#allocation3], %s2465_s28 }
 0x127   : > { %v514_v5 = vld [vmem:[%s3958_s30] sm:$0xff]  ;;  %v515_v11 = vld [vmem:[%s3958_s30 + $0x8] sm:$0xff]  ;;  %v516_v13 = vld [vmem:[%s3958_s30 + $0x10] sm:$0xff] }
 0x128   : > { %v522_v6 = vld [vmem:[%s3958_s30 + $0x40] sm:$0xff]  ;;  %2767 = vmatprep.mubr.bf16.mxu0 %v514_v5  ;;  %v523_v12 = vld [vmem:[%s3958_s30 + $0x48] sm:$0xff]  ;;  %v524_v14 = vld [vmem:[%s3958_s30 + $0x50] sm:$0xff] }
 0x129   : > { %2783 = vmatprep.mubr.bf16.mxu1 %v522_v6  ;;  %2756 = vmatpush3.bf16.msra.mxu0 %v3050_v3  ;;  %v517_v15 = vld [vmem:[%s3958_s30 + $0x18] sm:$0xff]  ;;  %v518_v17 = vld [vmem:[%s3958_s30 + $0x20] sm:$0xff]  ;;  %v519_v19 = vld [vmem:[%s3958_s30 + $0x28] sm:$0xff] }
 0x12a   : > { %2841 = vmatpush3.bf16.msra.mxu1 %v3050_v3  ;;  %2757 = vmatprep.subr.bf16.mxu0 %v3051_v4  ;;  %v525_v16 = vld [vmem:[%s3958_s30 + $0x58] sm:$0xff]  ;;  %v526_v18 = vld [vmem:[%s3958_s30 + $0x60] sm:$0xff]  ;;  %v527_v20 = vld [vmem:[%s3958_s30 + $0x68] sm:$0xff] }
 0x12b   : > { %2834 = vmatprep.subr.bf16.mxu1 %v3051_v4  ;;  %v520_v21 = vld [vmem:[%s3958_s30 + $0x30] sm:$0xff]  ;;  %v521_v23 = vld [vmem:[%s3958_s30 + $0x38] sm:$0xff] }
 0x12c   : > { %v528_v22 = vld [vmem:[%s3958_s30 + $0x70] sm:$0xff]  ;;  %v529_v24 = vld [vmem:[%s3958_s30 + $0x78] sm:$0xff] }
 0x12d   : > { %2758 = vmatpush3.bf16.msra.mxu0 %v3051_v4 }
 0x12e   : > { %2842 = vmatpush3.bf16.msra.mxu1 %v3051_v4  ;;  %2759 = vmatprep.subr.bf16.mxu0 %v3052_v7 }
 0x12f   : > { %2835 = vmatprep.subr.bf16.mxu1 %v3052_v7 }
 0x131   : > { %2760 = vmatpush3.bf16.msra.mxu0 %v3052_v7 }
 0x132   : > { %2843 = vmatpush3.bf16.msra.mxu1 %v3052_v7  ;;  %2761 = vmatprep.subr.bf16.mxu0 %v3053_v8 }
 0x133   : > { %2836 = vmatprep.subr.bf16.mxu1 %v3053_v8 }
 0x135   : > { %2762 = vmatpush3.bf16.msra.mxu0 %v3053_v8 }
 0x136   : > { %2844 = vmatpush3.bf16.msra.mxu1 %v3053_v8  ;;  %2763 = vmatprep.subr.bf16.mxu0 %v3054_v9 }
 0x137   : > { %2837 = vmatprep.subr.bf16.mxu1 %v3054_v9 }
 0x139   : > { %2764 = vmatpush3.bf16.msra.mxu0 %v3054_v9 }
 0x13a   : > { %2845 = vmatpush3.bf16.msra.mxu1 %v3054_v9  ;;  %2765 = vmatprep.subr.bf16.mxu0 %v3055_v10 }
 0x13b   : > { %2838 = vmatprep.subr.bf16.mxu1 %v3055_v10 }
 0x13d   : > { %2766 = vmatpush3.bf16.msra.mxu0 %v3055_v10 }
 0x13e   : > { %2846 = vmatpush3.bf16.msra.mxu1 %v3055_v10 }
 0x140   : > { %2768 = vmatmul.mubr.bf16.vlgmr.msra.gmra.mrb[0].mxu0 %v515_v11 }
 0x141   : > { %2784 = vmatmul.mubr.bf16.vlgmr.msra.gmra.mrb[0].mxu1 %v523_v12  ;;  %2771 = vmatprep.mubr.bf16.mxu0 %v516_v13 }
 0x142   : > { %2787 = vmatprep.mubr.bf16.mxu1 %v524_v14 }
 0x148   : > { %2772 = vmatmul.mubr.bf16.gmra.mrb[4].mxu0 %v517_v15 }
 0x149   : > { %2788 = vmatmul.mubr.bf16.gmra.mrb[4].mxu1 %v525_v16  ;;  %2775 = vmatprep.mubr.bf16.mxu0 %v518_v17 }
 0x14a   : > { %2791 = vmatprep.mubr.bf16.mxu1 %v526_v18 }
 0x150   : > { %2776 = vmatmul.mubr.bf16.gmra.mrb[8].mxu0 %v519_v19 }
 0x151   : > { %2792 = vmatmul.mubr.bf16.gmra.mrb[8].mxu1 %v527_v20  ;;  %2779 = vmatprep.mubr.bf16.mxu0 %v520_v21 }
 0x152   : > { %2795 = vmatprep.mubr.bf16.mxu1 %v528_v22 }
 0x158   : > { %2780 = vmatmul.mubr.bf16.gmra.mrb[12].mxu0 %v521_v23 }
 0x159   : > { %2796 = vmatmul.mubr.bf16.gmra.mrb[12].mxu1 %v529_v24 }
 0x213   : > { %v2769_v25 = vpop.f32.mrb[0].mxu0 }
 0x214   : > { %v2785_v26 = vpop.f32.mrb[0].mxu1  ;;  %v628_v27 = vpop.f32.mrb[1].mxu0 }
 0x215   : > { %v692_v28 = vpop.f32.mrb[1].mxu1  ;;  %v2770_v29 = vpop.f32.mrb[2].mxu0 }
 0x216   : > { %v2786_v30 = vpop.f32.mrb[2].mxu1  ;;  %v756_v31 = vpack.c.bf16 %v2770_v29, %v2769_v25  ;;  %v631_v33 = vpop.f32.mrb[3].mxu0 }
 0x217   : > { %v764_v32 = vpack.c.bf16 %v2786_v30, %v2785_v26  ;;  %v695_v34 = vpop.f32.mrb[3].mxu1  ;;  %v755_v35 = vpack.c.bf16 %v631_v33, %v628_v27 }
 0x218   : > { %v763_v36 = vpack.c.bf16 %v695_v34, %v692_v28  ;;  %772 = vst [vmem:[%s3958_s30 + $0x8] sm:$0xff] %v756_v31 }
 0x219   : > { %780 = vst [vmem:[%s3958_s30 + $0x48] sm:$0xff] %v764_v32  ;;  %771 = vst [vmem:[%s3958_s30] sm:$0xff] %v755_v35 }
 0x21a   : > { %779 = vst [vmem:[%s3958_s30 + $0x40] sm:$0xff] %v763_v36 }
 0x21b   : > { %v2773_v37 = vpop.f32.mrb[4].mxu0 }
 0x21c   : > { %v2789_v38 = vpop.f32.mrb[4].mxu1  ;;  %v644_v39 = vpop.f32.mrb[5].mxu0 }
 0x21d   : > { %v708_v40 = vpop.f32.mrb[5].mxu1  ;;  %v2774_v41 = vpop.f32.mrb[6].mxu0 }
 0x21e   : > { %v2790_v42 = vpop.f32.mrb[6].mxu1  ;;  %v758_v43 = vpack.c.bf16 %v2774_v41, %v2773_v37  ;;  %v647_v45 = vpop.f32.mrb[7].mxu0 }
 0x21f   : > { %v766_v44 = vpack.c.bf16 %v2790_v42, %v2789_v38  ;;  %v711_v46 = vpop.f32.mrb[7].mxu1  ;;  %v757_v47 = vpack.c.bf16 %v647_v45, %v644_v39 }
 0x220   : > { %v765_v48 = vpack.c.bf16 %v711_v46, %v708_v40  ;;  %774 = vst [vmem:[%s3958_s30 + $0x18] sm:$0xff] %v758_v43 }
 0x221   : > { %782 = vst [vmem:[%s3958_s30 + $0x58] sm:$0xff] %v766_v44  ;;  %773 = vst [vmem:[%s3958_s30 + $0x10] sm:$0xff] %v757_v47 }
 0x222   : > { %781 = vst [vmem:[%s3958_s30 + $0x50] sm:$0xff] %v765_v48 }
 0x223   : > { %v2777_v49 = vpop.f32.mrb[8].mxu0 }
 0x224   : > { %v2793_v50 = vpop.f32.mrb[8].mxu1  ;;  %v660_v51 = vpop.f32.mrb[9].mxu0 }
 0x225   : > { %v724_v52 = vpop.f32.mrb[9].mxu1  ;;  %v2778_v53 = vpop.f32.mrb[10].mxu0 }
 0x226   : > { %v2794_v54 = vpop.f32.mrb[10].mxu1  ;;  %v760_v55 = vpack.c.bf16 %v2778_v53, %v2777_v49  ;;  %v663_v57 = vpop.f32.mrb[11].mxu0 }
 0x227   : > { %v768_v56 = vpack.c.bf16 %v2794_v54, %v2793_v50  ;;  %v727_v58 = vpop.f32.mrb[11].mxu1  ;;  %v759_v59 = vpack.c.bf16 %v663_v57, %v660_v51 }
 0x228   : > { %v767_v60 = vpack.c.bf16 %v727_v58, %v724_v52  ;;  %776 = vst [vmem:[%s3958_s30 + $0x28] sm:$0xff] %v760_v55 }
 0x229   : > { %784 = vst [vmem:[%s3958_s30 + $0x68] sm:$0xff] %v768_v56  ;;  %775 = vst [vmem:[%s3958_s30 + $0x20] sm:$0xff] %v759_v59 }
 0x22a   : > { %783 = vst [vmem:[%s3958_s30 + $0x60] sm:$0xff] %v767_v60 }
 0x22b   : > { %v2781_v61 = vpop.f32.mrb[12].mxu0 }
 0x22c   : > { %v2797_v62 = vpop.f32.mrb[12].mxu1  ;;  %v676_v63 = vpop.f32.mrb[13].mxu0 }
 0x22d   : > { %v740_v0 = vpop.f32.mrb[13].mxu1  ;;  %v2782_v1 = vpop.f32.mrb[14].mxu0 }
 0x22e   : > { %v2798_v2 = vpop.f32.mrb[14].mxu1  ;;  %v762_v3 = vpack.c.bf16 %v2782_v1, %v2781_v61  ;;  %v679_v5 = vpop.f32.mrb[15].mxu0 }
 0x22f   : > { %v770_v4 = vpack.c.bf16 %v2798_v2, %v2797_v62  ;;  %v743_v6 = vpop.f32.mrb[15].mxu1  ;;  %v761_v7 = vpack.c.bf16 %v679_v5, %v676_v63 }
 0x230   : > { %v769_v8 = vpack.c.bf16 %v743_v6, %v740_v0  ;;  %778 = vst [vmem:[%s3958_s30 + $0x38] sm:$0xff] %v762_v3 }
 0x231   : > { %786 = vst [vmem:[%s3958_s30 + $0x78] sm:$0xff] %v770_v4  ;;  %777 = vst [vmem:[%s3958_s30 + $0x30] sm:$0xff] %v761_v7 }
 0x232   : > { %785 = vst [vmem:[%s3958_s30 + $0x70] sm:$0xff] %v769_v8 }
 0x233 PF: > { %s4353_s14 = sld [smem:[#allocation29_spill]] }
 0x239   : > { %p787_p2 = scmp.eq.s32.totalorder %s4353_s14, 0  ;;  %p2372_p9 = scmp.ne.s32.totalorder %s4353_s14, 0 }
 0x23a   : > { %v3481_v9 = vmov (!%p2372_p9), 0.0  }
 0x23b   : > { %790 = sbr.rel (%p2372_p9) target bundleno = 587 (0x24b), region = 80  ;;  %791 = vst [vmem:[#allocation2] sm:$0xff] (!%p2372_p9), %v3481_v9  ;;  %792 = vst [vmem:[#allocation2 + $0x8] sm:$0xff] (!%p2372_p9), %v3481_v9 }
 0x23c   : > { %793 = vst [vmem:[#allocation2 + $0x10] sm:$0xff] (!%p2372_p9), %v3481_v9  ;;  %794 = vst [vmem:[#allocation2 + $0x18] sm:$0xff] (!%p2372_p9), %v3481_v9 }
 0x23d   : > { %795 = vst [vmem:[#allocation2 + $0x20] sm:$0xff] (!%p2372_p9), %v3481_v9  ;;  %796 = vst [vmem:[#allocation2 + $0x28] sm:$0xff] (!%p2372_p9), %v3481_v9 }
 0x23e   : > { %797 = vst [vmem:[#allocation2 + $0x30] sm:$0xff] (!%p2372_p9), %v3481_v9  ;;  %798 = vst [vmem:[#allocation2 + $0x38] sm:$0xff] (!%p2372_p9), %v3481_v9 }
 0x23f   : > { %799 = vst [vmem:[#allocation2 + $0x40] sm:$0xff] (!%p2372_p9), %v3481_v9  ;;  %800 = vst [vmem:[#allocation2 + $0x48] sm:$0xff] (!%p2372_p9), %v3481_v9 }
 0x240   : > { %801 = vst [vmem:[#allocation2 + $0x50] sm:$0xff] (!%p2372_p9), %v3481_v9  ;;  %802 = vst [vmem:[#allocation2 + $0x58] sm:$0xff] (!%p2372_p9), %v3481_v9 }
 0x241   : > { %803 = vst [vmem:[#allocation2 + $0x60] sm:$0xff] (!%p2372_p9), %v3481_v9  ;;  %804 = vst [vmem:[#allocation2 + $0x68] sm:$0xff] (!%p2372_p9), %v3481_v9 }
 0x242   : > { %805 = vst [vmem:[#allocation2 + $0x70] sm:$0xff] %v3481_v9  ;;  %806 = vst [vmem:[#allocation2 + $0x78] sm:$0xff] %v3481_v9 }
 0x243   : > { %807 = vst [vmem:[#allocation2 + $0x80] sm:$0xff] %v3481_v9  ;;  %808 = vst [vmem:[#allocation2 + $0x88] sm:$0xff] %v3481_v9 }
 0x244   : > { %809 = vst [vmem:[#allocation2 + $0x90] sm:$0xff] %v3481_v9  ;;  %810 = vst [vmem:[#allocation2 + $0x98] sm:$0xff] %v3481_v9 }
 0x245   : > { %811 = vst [vmem:[#allocation2 + $0xa0] sm:$0xff] %v3481_v9  ;;  %812 = vst [vmem:[#allocation2 + $0xa8] sm:$0xff] %v3481_v9 }
 0x246   : > { %813 = vst [vmem:[#allocation2 + $0xb0] sm:$0xff] %v3481_v9  ;;  %814 = vst [vmem:[#allocation2 + $0xb8] sm:$0xff] %v3481_v9 }
 0x247   : > { %815 = vst [vmem:[#allocation2 + $0xc0] sm:$0xff] %v3481_v9  ;;  %816 = vst [vmem:[#allocation2 + $0xc8] sm:$0xff] %v3481_v9 }
 0x248   : > { %817 = vst [vmem:[#allocation2 + $0xd0] sm:$0xff] %v3481_v9  ;;  %818 = vst [vmem:[#allocation2 + $0xd8] sm:$0xff] %v3481_v9 }
 0x249   : > { %819 = vst [vmem:[#allocation2 + $0xe0] sm:$0xff] %v3481_v9  ;;  %820 = vst [vmem:[#allocation2 + $0xe8] sm:$0xff] %v3481_v9 }
 0x24a   : > { %821 = vst [vmem:[#allocation2 + $0xf0] sm:$0xff] %v3481_v9  ;;  %822 = vst [vmem:[#allocation2 + $0xf8] sm:$0xff] %v3481_v9 }
 0x24b PF: > { %p823_p4 = pnand %p787_p2, %p506_p1 }
 0x24d   : > { %p824_p11 = pneg %p823_p4 }
 0x24f   : > { %p825_p7 = pnand %p824_p11, %p501_p8 }
 0x250   : > { %v3482_v10 = vmov (!%p825_p7), 0.0  }
 0x251   : > { %828 = sbr.rel (%p825_p7) target bundleno = 600 (0x258), region = 84  ;;  %829 = vst [vmem:[#allocation4] sm:$0xff] (!%p825_p7), %v3482_v10 }
 0x258 PF: > { %p830_p0 = pnand %p505_p12, %p500_p10 }
 0x259   : > { %v3056_v11 = vld [vmem:[%s3924_s6 + $0x40] sm:$0xff] (!%p830_p0)   ;;  %v3058_v13 = vld [vmem:[%s3924_s6 + $0x48] sm:$0xff] (!%p830_p0)   ;;  %v3060_v15 = vld [vmem:[%s3924_s6 + $0x50] sm:$0xff] (!%p830_p0)  }
 0x25a   : > { %833 = sbr.rel (%p830_p0) target bundleno = 910 (0x38e), region = 88  ;;  %v3057_v12 = vld [vmem:[%s3924_s6] sm:$0xff] (!%p830_p0)   ;;  %2492 = vmatprep.subr.bf16.mxu0 (!%p830_p0), %v3056_v11  ;;  %2847 = vmatprep.subr.bf16.mxu1 (!%p830_p0), %v3056_v11  ;;  %v3059_v14 = vld [vmem:[%s3924_s6 + $0x8] sm:$0xff] (!%p830_p0)   ;;  %v3061_v16 = vld [vmem:[%s3924_s6 + $0x10] sm:$0xff] (!%p830_p0)  }
 0x25b   : > { %2493 = vmatpush3.bf16.msra.mxu0 (!%p830_p0), %v3057_v12  ;;  %2855 = vmatpush3.bf16.msra.mxu1 (!%p830_p0), %v3057_v12  ;;  %v3062_v17 = vld [vmem:[%s3924_s6 + $0x58] sm:$0xff] (!%p830_p0)   ;;  %v3064_v19 = vld [vmem:[%s3924_s6 + $0x60] sm:$0xff] (!%p830_p0)   ;;  %v3066_v21 = vld [vmem:[%s3924_s6 + $0x68] sm:$0xff] (!%p830_p0)  }
 0x25c   : > { %2494 = vmatprep.subr.bf16.mxu0 (!%p830_p0), %v3058_v13  ;;  %2848 = vmatprep.subr.bf16.mxu1 (!%p830_p0), %v3058_v13  ;;  %v3063_v18 = vld [vmem:[%s3924_s6 + $0x18] sm:$0xff] (!%p830_p0)   ;;  %v3065_v20 = vld [vmem:[%s3924_s6 + $0x20] sm:$0xff] (!%p830_p0)   ;;  %v3067_v24 = vld [vmem:[%s3924_s6 + $0x28] sm:$0xff] (!%p830_p0)  }
 0x25d   : > { %v3074_v22 = vld [vmem:[%s3915_s12 + $0x4] ss:$8 sps:$4 sm:$0xff] (!%p830_p0)   ;;  %v3068_v25 = vld [vmem:[%s3924_s6 + $0x70] sm:$0xff] (!%p830_p0)   ;;  %v3070_v27 = vld [vmem:[%s3924_s6 + $0x78] sm:$0xff] (!%p830_p0)  }
 0x25e   : > { %v3077_v23 = vld [vmem:[%s3915_s12 + $0x84] ss:$8 sps:$4 sm:$0xff] (!%p830_p0)   ;;  %1218 = vmatprep.mubr.bf16.mxu0 (!%p830_p0), %v3074_v22  ;;  %v3069_v26 = vld [vmem:[%s3924_s6 + $0x30] sm:$0xff] (!%p830_p0)   ;;  %v3071_v28 = vld [vmem:[%s3924_s6 + $0x38] sm:$0xff] (!%p830_p0)  }
 0x25f   : > { %2495 = vmatpush3.bf16.msra.mxu0 (!%p830_p0), %v3059_v14  ;;  %2856 = vmatpush3.bf16.msra.mxu1 (!%p830_p0), %v3059_v14  ;;  %v3072_v29 = vld [vmem:[%s3915_s12] ss:$8 sps:$4 sm:$0xff] (!%p830_p0)   ;;  %v3078_v31 = vld [vmem:[%s3915_s12 + $0x14] ss:$8 sps:$4 sm:$0xff] (!%p830_p0)   ;;  %v3082_v33 = vld [vmem:[%s3915_s12 + $0x10] ss:$8 sps:$4 sm:$0xff] (!%p830_p0)  }
 0x260   : > { %2496 = vmatprep.subr.bf16.mxu0 (!%p830_p0), %v3060_v15  ;;  %2849 = vmatprep.subr.bf16.mxu1 (!%p830_p0), %v3060_v15  ;;  %v3075_v30 = vld [vmem:[%s3915_s12 + $0x80] ss:$8 sps:$4 sm:$0xff] (!%p830_p0)   ;;  %v3080_v32 = vld [vmem:[%s3915_s12 + $0x94] ss:$8 sps:$4 sm:$0xff] (!%p830_p0)   ;;  %v3083_v34 = vld [vmem:[%s3915_s12 + $0x90] ss:$8 sps:$4 sm:$0xff] (!%p830_p0)  }
 0x261   : > { %1282 = vmatprep.mubr.bf16.mxu1 %v3077_v23  ;;  %v3084_v35 = vld [vmem:[%s3915_s12 + $0x24] ss:$8 sps:$4 sm:$0xff]   ;;  %v3088_v37 = vld [vmem:[%s3915_s12 + $0x20] ss:$8 sps:$4 sm:$0xff]   ;;  %v3090_v39 = vld [vmem:[%s3915_s12 + $0x34] ss:$8 sps:$4 sm:$0xff]  }
 0x262   : > { %v3086_v36 = vld [vmem:[%s3915_s12 + $0xa4] ss:$8 sps:$4 sm:$0xff]   ;;  %v3089_v38 = vld [vmem:[%s3915_s12 + $0xa0] ss:$8 sps:$4 sm:$0xff]   ;;  %v3092_v40 = vld [vmem:[%s3915_s12 + $0xb4] ss:$8 sps:$4 sm:$0xff]  }
 0x263   : > { %2497 = vmatpush3.bf16.msra.mxu0 %v3061_v16  ;;  %2857 = vmatpush3.bf16.msra.mxu1 %v3061_v16  ;;  %v3094_v41 = vld [vmem:[%s3915_s12 + $0x30] ss:$8 sps:$4 sm:$0xff]   ;;  %v3096_v43 = vld [vmem:[%s3915_s12 + $0x44] ss:$8 sps:$4 sm:$0xff]   ;;  %v3100_v45 = vld [vmem:[%s3915_s12 + $0x40] ss:$8 sps:$4 sm:$0xff]  }
 0x264   : > { %2498 = vmatprep.subr.bf16.mxu0 %v3062_v17  ;;  %2850 = vmatprep.subr.bf16.mxu1 %v3062_v17  ;;  %v3095_v42 = vld [vmem:[%s3915_s12 + $0xb0] ss:$8 sps:$4 sm:$0xff]   ;;  %v3098_v44 = vld [vmem:[%s3915_s12 + $0xc4] ss:$8 sps:$4 sm:$0xff]   ;;  %v3101_v46 = vld [vmem:[%s3915_s12 + $0xc0] ss:$8 sps:$4 sm:$0xff]  }
 0x265   : > { %v3102_v47 = vld [vmem:[%s3915_s12 + $0x54] ss:$8 sps:$4 sm:$0xff]   ;;  %v3106_v49 = vld [vmem:[%s3915_s12 + $0x50] ss:$8 sps:$4 sm:$0xff]   ;;  %v3108_v51 = vld [vmem:[%s3915_s12 + $0x64] ss:$8 sps:$4 sm:$0xff]  }
 0x266   : > { %v3104_v48 = vld [vmem:[%s3915_s12 + $0xd4] ss:$8 sps:$4 sm:$0xff]   ;;  %v3107_v50 = vld [vmem:[%s3915_s12 + $0xd0] ss:$8 sps:$4 sm:$0xff]   ;;  %v3110_v52 = vld [vmem:[%s3915_s12 + $0xe4] ss:$8 sps:$4 sm:$0xff]  }
 0x267   : > { %2499 = vmatpush3.bf16.msra.mxu0 %v3063_v18  ;;  %2858 = vmatpush3.bf16.msra.mxu1 %v3063_v18  ;;  %v3112_v53 = vld [vmem:[%s3915_s12 + $0x60] ss:$8 sps:$4 sm:$0xff]   ;;  %v3114_v55 = vld [vmem:[%s3915_s12 + $0x74] ss:$8 sps:$4 sm:$0xff]   ;;  %v3118_v57 = vld [vmem:[%s3915_s12 + $0x70] ss:$8 sps:$4 sm:$0xff]  }
 0x268   : > { %2500 = vmatprep.subr.bf16.mxu0 %v3064_v19  ;;  %2851 = vmatprep.subr.bf16.mxu1 %v3064_v19  ;;  %v3113_v54 = vld [vmem:[%s3915_s12 + $0xe0] ss:$8 sps:$4 sm:$0xff]   ;;  %v3116_v56 = vld [vmem:[%s3915_s12 + $0xf4] ss:$8 sps:$4 sm:$0xff]   ;;  %v3119_v58 = vld [vmem:[%s3915_s12 + $0xf0] ss:$8 sps:$4 sm:$0xff]  }
 0x269   : > { %v834_v61 = vld [vmem:[#allocation2] sm:$0xff]  ;;  %v835_v5 = vld [vmem:[#allocation2 + $0x8] sm:$0xff]  ;;  %v836_v17 = vld [vmem:[#allocation2 + $0x10] sm:$0xff] }
 0x26a   : > { %v850_v63 = vld [vmem:[#allocation2 + $0x80] sm:$0xff]  ;;  %v851_v7 = vld [vmem:[#allocation2 + $0x88] sm:$0xff]  ;;  %v852_v19 = vld [vmem:[#allocation2 + $0x90] sm:$0xff] }
 0x26b   : > { %2501 = vmatpush3.bf16.msra.mxu0 %v3065_v20  ;;  %2859 = vmatpush3.bf16.msra.mxu1 %v3065_v20 }
 0x26c   : > { %2502 = vmatprep.subr.bf16.mxu0 %v3066_v21  ;;  %2852 = vmatprep.subr.bf16.mxu1 %v3066_v21 }
 0x26f   : > { %2503 = vmatpush3.bf16.msra.mxu0 %v3067_v24  ;;  %2860 = vmatpush3.bf16.msra.mxu1 %v3067_v24 }
 0x270   : > { %2504 = vmatprep.subr.bf16.mxu0 %v3068_v25  ;;  %2853 = vmatprep.subr.bf16.mxu1 %v3068_v25  ;;  %v837_v25 = vld [vmem:[#allocation2 + $0x18] sm:$0xff] }
 0x273   : > { %2505 = vmatpush3.bf16.msra.mxu0 %v3069_v26  ;;  %2861 = vmatpush3.bf16.msra.mxu1 %v3069_v26 }
 0x274   : > { %2506 = vmatprep.subr.bf16.mxu0 %v3070_v27  ;;  %2854 = vmatprep.subr.bf16.mxu1 %v3070_v27  ;;  %v853_v27 = vld [vmem:[#allocation2 + $0x98] sm:$0xff] }
 0x277   : > { %2507 = vmatpush3.bf16.msra.mxu0 %v3071_v28  ;;  %2862 = vmatpush3.bf16.msra.mxu1 %v3071_v28 }
 0x27a   : > { %1219 = vmatmul.mubr.bf16.vlgmr.msra.gmra.mrb[0].mxu0 %v3072_v29  ;;  %1283 = vmatmul.mubr.bf16.vlgmr.msra.gmra.mrb[0].mxu1 %v3075_v30 }
 0x27b   : > { %1226 = vmatprep.mubr.bf16.mxu0 %v3078_v31  ;;  %1290 = vmatprep.mubr.bf16.mxu1 %v3080_v32 }
 0x282   : > { %1227 = vmatmul.mubr.bf16.gmra.mrb[4].mxu0 %v3082_v33  ;;  %1291 = vmatmul.mubr.bf16.gmra.mrb[4].mxu1 %v3083_v34 }
 0x283   : > { %1234 = vmatprep.mubr.bf16.mxu0 %v3084_v35  ;;  %1298 = vmatprep.mubr.bf16.mxu1 %v3086_v36 }
 0x28a   : > { %1235 = vmatmul.mubr.bf16.gmra.mrb[8].mxu0 %v3088_v37  ;;  %1299 = vmatmul.mubr.bf16.gmra.mrb[8].mxu1 %v3089_v38  ;;  %v838_v37 = vld [vmem:[#allocation2 + $0x20] sm:$0xff] }
 0x28b   : > { %1242 = vmatprep.mubr.bf16.mxu0 %v3090_v39  ;;  %1306 = vmatprep.mubr.bf16.mxu1 %v3092_v40  ;;  %v854_v39 = vld [vmem:[#allocation2 + $0xa0] sm:$0xff] }
 0x292   : > { %1243 = vmatmul.mubr.bf16.gmra.mrb[12].mxu0 %v3094_v41  ;;  %1307 = vmatmul.mubr.bf16.gmra.mrb[12].mxu1 %v3095_v42 }
 0x293   : > { %1250 = vmatprep.mubr.bf16.mxu0 %v3096_v43  ;;  %1314 = vmatprep.mubr.bf16.mxu1 %v3098_v44 }
 0x29a   : > { %1251 = vmatmul.mubr.bf16.gmra.mrb[16].mxu0 %v3100_v45  ;;  %1315 = vmatmul.mubr.bf16.gmra.mrb[16].mxu1 %v3101_v46  ;;  %v839_v45 = vld [vmem:[#allocation2 + $0x28] sm:$0xff] }
 0x29b   : > { %1258 = vmatprep.mubr.bf16.mxu0 %v3102_v47  ;;  %1322 = vmatprep.mubr.bf16.mxu1 %v3104_v48  ;;  %v855_v47 = vld [vmem:[#allocation2 + $0xa8] sm:$0xff] }
 0x2a2   : > { %1259 = vmatmul.mubr.bf16.gmra.mrb[20].mxu0 %v3106_v49  ;;  %1323 = vmatmul.mubr.bf16.gmra.mrb[20].mxu1 %v3107_v50 }
 0x2a3   : > { %1266 = vmatprep.mubr.bf16.mxu0 %v3108_v51  ;;  %1330 = vmatprep.mubr.bf16.mxu1 %v3110_v52 }
 0x2aa   : > { %1267 = vmatmul.mubr.bf16.gmra.mrb[24].mxu0 %v3112_v53  ;;  %1331 = vmatmul.mubr.bf16.gmra.mrb[24].mxu1 %v3113_v54 }
 0x2ab   : > { %1274 = vmatprep.mubr.bf16.mxu0 %v3114_v55  ;;  %1338 = vmatprep.mubr.bf16.mxu1 %v3116_v56 }
 0x2b2   : > { %1275 = vmatmul.mubr.bf16.gmra.mrb[28].mxu0 %v3118_v57  ;;  %1339 = vmatmul.mubr.bf16.gmra.mrb[28].mxu1 %v3119_v58  ;;  %v840_v57 = vld [vmem:[#allocation2 + $0x30] sm:$0xff] }
 0x34d   : > { %v2508_v59 = vpop.f32.mrb[0].mxu0  ;;  %v2556_v60 = vpop.f32.mrb[0].mxu1 }
 0x34e   : > { %v2509_v62 = vpop.f32.mrb[1].mxu0  ;;  %v2557_v0 = vpop.f32.mrb[1].mxu1 }
 0x34f   : > { %v2510_v1 = vadd.f32 %v2509_v62, %v2508_v59  ;;  %v2558_v2 = vadd.f32 %v2557_v0, %v2556_v60  ;;  %v2511_v3 = vpop.f32.mrb[2].mxu0  ;;  %v2559_v4 = vpop.f32.mrb[2].mxu1  ;;  %v856_v59 = vld [vmem:[#allocation2 + $0xb0] sm:$0xff] }
 0x350   : > { %v2512_v6 = vpop.f32.mrb[3].mxu0  ;;  %v2560_v8 = vpop.f32.mrb[3].mxu1 }
 0x351   : > { %v1347_v9 = vadd.f32 %v2510_v1, %v834_v61  ;;  %v1363_v10 = vadd.f32 %v2558_v2, %v850_v63  ;;  %v2513_v11 = vadd.f32 %v2512_v6, %v2511_v3  ;;  %v2561_v12 = vadd.f32 %v2560_v8, %v2559_v4  ;;  %v841_v1 = vld [vmem:[#allocation2 + $0x38] sm:$0xff] }
 0x352   : > { %v857_v3 = vld [vmem:[#allocation2 + $0xb8] sm:$0xff] }
 0x353   : > { %1379 = vst [vmem:[#allocation2] sm:$0xff] %v1347_v9  ;;  %1395 = vst [vmem:[#allocation2 + $0x80] sm:$0xff] %v1363_v10  ;;  %v1348_v13 = vadd.f32 %v2513_v11, %v835_v5  ;;  %v1364_v14 = vadd.f32 %v2561_v12, %v851_v7 }
 0x355   : > { %1380 = vst [vmem:[#allocation2 + $0x8] sm:$0xff] %v1348_v13  ;;  %1396 = vst [vmem:[#allocation2 + $0x88] sm:$0xff] %v1364_v14  ;;  %v2514_v15 = vpop.f32.mrb[4].mxu0  ;;  %v2562_v16 = vpop.f32.mrb[4].mxu1  ;;  %v842_v13 = vld [vmem:[#allocation2 + $0x40] sm:$0xff] }
 0x356   : > { %v2515_v18 = vpop.f32.mrb[5].mxu0  ;;  %v2563_v20 = vpop.f32.mrb[5].mxu1 }
 0x357   : > { %v2516_v21 = vadd.f32 %v2515_v18, %v2514_v15  ;;  %v2564_v22 = vadd.f32 %v2563_v20, %v2562_v16  ;;  %v2517_v23 = vpop.f32.mrb[6].mxu0  ;;  %v2565_v24 = vpop.f32.mrb[6].mxu1  ;;  %v858_v15 = vld [vmem:[#allocation2 + $0xc0] sm:$0xff] }
 0x358   : > { %v2518_v26 = vpop.f32.mrb[7].mxu0  ;;  %v2566_v28 = vpop.f32.mrb[7].mxu1 }
 0x359   : > { %v1349_v29 = vadd.f32 %v2516_v21, %v836_v17  ;;  %v1365_v30 = vadd.f32 %v2564_v22, %v852_v19  ;;  %v2519_v31 = vadd.f32 %v2518_v26, %v2517_v23  ;;  %v2567_v32 = vadd.f32 %v2566_v28, %v2565_v24  ;;  %v843_v21 = vld [vmem:[#allocation2 + $0x48] sm:$0xff] }
 0x35a   : > { %v859_v23 = vld [vmem:[#allocation2 + $0xc8] sm:$0xff] }
 0x35b   : > { %1381 = vst [vmem:[#allocation2 + $0x10] sm:$0xff] %v1349_v29  ;;  %1397 = vst [vmem:[#allocation2 + $0x90] sm:$0xff] %v1365_v30  ;;  %v1350_v33 = vadd.f32 %v2519_v31, %v837_v25  ;;  %v1366_v34 = vadd.f32 %v2567_v32, %v853_v27 }
 0x35d   : > { %1382 = vst [vmem:[#allocation2 + $0x18] sm:$0xff] %v1350_v33  ;;  %1398 = vst [vmem:[#allocation2 + $0x98] sm:$0xff] %v1366_v34  ;;  %v2520_v35 = vpop.f32.mrb[8].mxu0  ;;  %v2568_v36 = vpop.f32.mrb[8].mxu1  ;;  %v844_v33 = vld [vmem:[#allocation2 + $0x50] sm:$0xff] }
 0x35e   : > { %v2521_v38 = vpop.f32.mrb[9].mxu0  ;;  %v2569_v40 = vpop.f32.mrb[9].mxu1 }
 0x35f   : > { %v2522_v41 = vadd.f32 %v2521_v38, %v2520_v35  ;;  %v2570_v42 = vadd.f32 %v2569_v40, %v2568_v36  ;;  %v2523_v43 = vpop.f32.mrb[10].mxu0  ;;  %v2571_v44 = vpop.f32.mrb[10].mxu1  ;;  %v860_v35 = vld [vmem:[#allocation2 + $0xd0] sm:$0xff] }
 0x360   : > { %v2524_v46 = vpop.f32.mrb[11].mxu0  ;;  %v2572_v48 = vpop.f32.mrb[11].mxu1 }
 0x361   : > { %v1351_v49 = vadd.f32 %v2522_v41, %v838_v37  ;;  %v1367_v50 = vadd.f32 %v2570_v42, %v854_v39  ;;  %v2525_v51 = vadd.f32 %v2524_v46, %v2523_v43  ;;  %v2573_v52 = vadd.f32 %v2572_v48, %v2571_v44  ;;  %v845_v41 = vld [vmem:[#allocation2 + $0x58] sm:$0xff] }
 0x362   : > { %v861_v43 = vld [vmem:[#allocation2 + $0xd8] sm:$0xff] }
 0x363   : > { %1383 = vst [vmem:[#allocation2 + $0x20] sm:$0xff] %v1351_v49  ;;  %1399 = vst [vmem:[#allocation2 + $0xa0] sm:$0xff] %v1367_v50  ;;  %v1352_v53 = vadd.f32 %v2525_v51, %v839_v45  ;;  %v1368_v54 = vadd.f32 %v2573_v52, %v855_v47 }
 0x365   : > { %1384 = vst [vmem:[#allocation2 + $0x28] sm:$0xff] %v1352_v53  ;;  %1400 = vst [vmem:[#allocation2 + $0xa8] sm:$0xff] %v1368_v54  ;;  %v2526_v55 = vpop.f32.mrb[12].mxu0  ;;  %v2574_v56 = vpop.f32.mrb[12].mxu1  ;;  %v846_v53 = vld [vmem:[#allocation2 + $0x60] sm:$0xff] }
 0x366   : > { %v2527_v58 = vpop.f32.mrb[13].mxu0  ;;  %v2575_v60 = vpop.f32.mrb[13].mxu1 }
 0x367   : > { %v2528_v61 = vadd.f32 %v2527_v58, %v2526_v55  ;;  %v2576_v62 = vadd.f32 %v2575_v60, %v2574_v56  ;;  %v2529_v63 = vpop.f32.mrb[14].mxu0  ;;  %v2577_v0 = vpop.f32.mrb[14].mxu1  ;;  %v862_v55 = vld [vmem:[#allocation2 + $0xe0] sm:$0xff] }
 0x368   : > { %v2530_v2 = vpop.f32.mrb[15].mxu0  ;;  %v2578_v4 = vpop.f32.mrb[15].mxu1 }
 0x369   : > { %v1353_v5 = vadd.f32 %v2528_v61, %v840_v57  ;;  %v1369_v6 = vadd.f32 %v2576_v62, %v856_v59  ;;  %v2531_v7 = vadd.f32 %v2530_v2, %v2529_v63  ;;  %v2579_v8 = vadd.f32 %v2578_v4, %v2577_v0  ;;  %v847_v61 = vld [vmem:[#allocation2 + $0x68] sm:$0xff] }
 0x36a   : > { %v863_v63 = vld [vmem:[#allocation2 + $0xe8] sm:$0xff] }
 0x36b   : > { %1385 = vst [vmem:[#allocation2 + $0x30] sm:$0xff] %v1353_v5  ;;  %1401 = vst [vmem:[#allocation2 + $0xb0] sm:$0xff] %v1369_v6  ;;  %v1354_v9 = vadd.f32 %v2531_v7, %v841_v1  ;;  %v1370_v10 = vadd.f32 %v2579_v8, %v857_v3 }
 0x36d   : > { %1386 = vst [vmem:[#allocation2 + $0x38] sm:$0xff] %v1354_v9  ;;  %1402 = vst [vmem:[#allocation2 + $0xb8] sm:$0xff] %v1370_v10  ;;  %v2532_v11 = vpop.f32.mrb[16].mxu0  ;;  %v2580_v12 = vpop.f32.mrb[16].mxu1  ;;  %v848_v9 = vld [vmem:[#allocation2 + $0x70] sm:$0xff] }
 0x36e   : > { %v2533_v14 = vpop.f32.mrb[17].mxu0  ;;  %v2581_v16 = vpop.f32.mrb[17].mxu1 }
 0x36f   : > { %v2534_v17 = vadd.f32 %v2533_v14, %v2532_v11  ;;  %v2582_v18 = vadd.f32 %v2581_v16, %v2580_v12  ;;  %v2535_v19 = vpop.f32.mrb[18].mxu0  ;;  %v2583_v20 = vpop.f32.mrb[18].mxu1  ;;  %v864_v11 = vld [vmem:[#allocation2 + $0xf0] sm:$0xff] }
 0x370   : > { %v2536_v22 = vpop.f32.mrb[19].mxu0  ;;  %v2584_v24 = vpop.f32.mrb[19].mxu1 }
 0x371   : > { %v1355_v25 = vadd.f32 %v2534_v17, %v842_v13  ;;  %v1371_v26 = vadd.f32 %v2582_v18, %v858_v15  ;;  %v2537_v27 = vadd.f32 %v2536_v22, %v2535_v19  ;;  %v2585_v28 = vadd.f32 %v2584_v24, %v2583_v20  ;;  %v849_v17 = vld [vmem:[#allocation2 + $0x78] sm:$0xff] }
 0x372   : > { %v865_v19 = vld [vmem:[#allocation2 + $0xf8] sm:$0xff] }
 0x373   : > { %1387 = vst [vmem:[#allocation2 + $0x40] sm:$0xff] %v1355_v25  ;;  %1403 = vst [vmem:[#allocation2 + $0xc0] sm:$0xff] %v1371_v26  ;;  %v1356_v29 = vadd.f32 %v2537_v27, %v843_v21  ;;  %v1372_v30 = vadd.f32 %v2585_v28, %v859_v23 }
 0x375   : > { %1388 = vst [vmem:[#allocation2 + $0x48] sm:$0xff] %v1356_v29  ;;  %1404 = vst [vmem:[#allocation2 + $0xc8] sm:$0xff] %v1372_v30  ;;  %v2538_v31 = vpop.f32.mrb[20].mxu0  ;;  %v2586_v32 = vpop.f32.mrb[20].mxu1 }
 0x376   : > { %v2539_v34 = vpop.f32.mrb[21].mxu0  ;;  %v2587_v36 = vpop.f32.mrb[21].mxu1 }
 0x377   : > { %v2540_v37 = vadd.f32 %v2539_v34, %v2538_v31  ;;  %v2588_v38 = vadd.f32 %v2587_v36, %v2586_v32  ;;  %v2541_v39 = vpop.f32.mrb[22].mxu0  ;;  %v2589_v40 = vpop.f32.mrb[22].mxu1 }
 0x378   : > { %v2542_v42 = vpop.f32.mrb[23].mxu0  ;;  %v2590_v44 = vpop.f32.mrb[23].mxu1 }
 0x379   : > { %v1357_v45 = vadd.f32 %v2540_v37, %v844_v33  ;;  %v1373_v46 = vadd.f32 %v2588_v38, %v860_v35  ;;  %v2543_v47 = vadd.f32 %v2542_v42, %v2541_v39  ;;  %v2591_v48 = vadd.f32 %v2590_v44, %v2589_v40 }
 0x37b   : > { %1389 = vst [vmem:[#allocation2 + $0x50] sm:$0xff] %v1357_v45  ;;  %1405 = vst [vmem:[#allocation2 + $0xd0] sm:$0xff] %v1373_v46  ;;  %v1358_v49 = vadd.f32 %v2543_v47, %v845_v41  ;;  %v1374_v50 = vadd.f32 %v2591_v48, %v861_v43 }
 0x37d   : > { %1390 = vst [vmem:[#allocation2 + $0x58] sm:$0xff] %v1358_v49  ;;  %1406 = vst [vmem:[#allocation2 + $0xd8] sm:$0xff] %v1374_v50  ;;  %v2544_v51 = vpop.f32.mrb[24].mxu0  ;;  %v2592_v52 = vpop.f32.mrb[24].mxu1 }
 0x37e   : > { %v2545_v54 = vpop.f32.mrb[25].mxu0  ;;  %v2593_v56 = vpop.f32.mrb[25].mxu1 }
 0x37f   : > { %v2546_v57 = vadd.f32 %v2545_v54, %v2544_v51  ;;  %v2594_v58 = vadd.f32 %v2593_v56, %v2592_v52  ;;  %v2547_v59 = vpop.f32.mrb[26].mxu0  ;;  %v2595_v60 = vpop.f32.mrb[26].mxu1 }
 0x380   : > { %v2548_v62 = vpop.f32.mrb[27].mxu0  ;;  %v2596_v0 = vpop.f32.mrb[27].mxu1 }
 0x381   : > { %v1359_v1 = vadd.f32 %v2546_v57, %v846_v53  ;;  %v1375_v2 = vadd.f32 %v2594_v58, %v862_v55  ;;  %v2549_v3 = vadd.f32 %v2548_v62, %v2547_v59  ;;  %v2597_v4 = vadd.f32 %v2596_v0, %v2595_v60 }
 0x383   : > { %1391 = vst [vmem:[#allocation2 + $0x60] sm:$0xff] %v1359_v1  ;;  %1407 = vst [vmem:[#allocation2 + $0xe0] sm:$0xff] %v1375_v2  ;;  %v1360_v5 = vadd.f32 %v2549_v3, %v847_v61  ;;  %v1376_v6 = vadd.f32 %v2597_v4, %v863_v63 }
 0x385   : > { %1392 = vst [vmem:[#allocation2 + $0x68] sm:$0xff] %v1360_v5  ;;  %1408 = vst [vmem:[#allocation2 + $0xe8] sm:$0xff] %v1376_v6  ;;  %v2550_v7 = vpop.f32.mrb[28].mxu0  ;;  %v2598_v8 = vpop.f32.mrb[28].mxu1 }
 0x386   : > { %v2551_v10 = vpop.f32.mrb[29].mxu0  ;;  %v2599_v12 = vpop.f32.mrb[29].mxu1 }
 0x387   : > { %v2552_v13 = vadd.f32 %v2551_v10, %v2550_v7  ;;  %v2600_v14 = vadd.f32 %v2599_v12, %v2598_v8  ;;  %v2553_v15 = vpop.f32.mrb[30].mxu0  ;;  %v2601_v16 = vpop.f32.mrb[30].mxu1 }
 0x388   : > { %v2554_v18 = vpop.f32.mrb[31].mxu0  ;;  %v2602_v20 = vpop.f32.mrb[31].mxu1 }
 0x389   : > { %v1361_v21 = vadd.f32 %v2552_v13, %v848_v9  ;;  %v1377_v22 = vadd.f32 %v2600_v14, %v864_v11  ;;  %v2555_v23 = vadd.f32 %v2554_v18, %v2553_v15  ;;  %v2603_v24 = vadd.f32 %v2602_v20, %v2601_v16 }
 0x38b   : > { %1393 = vst [vmem:[#allocation2 + $0x70] sm:$0xff] %v1361_v21  ;;  %1409 = vst [vmem:[#allocation2 + $0xf0] sm:$0xff] %v1377_v22  ;;  %v1362_v25 = vadd.f32 %v2555_v23, %v849_v17  ;;  %v1378_v26 = vadd.f32 %v2603_v24, %v865_v19 }
 0x38d   : > { %1394 = vst [vmem:[#allocation2 + $0x78] sm:$0xff] %v1362_v25  ;;  %1410 = vst [vmem:[#allocation2 + $0xf8] sm:$0xff] %v1378_v26 }
 0x38e PF: > { %p1411_p13 = pnand %p505_p12, %p501_p8 }
 0x38f   : > { %s4359_s24 = sld [smem:[#allocation29_spill]] (!%p1411_p13)  ;;  %v3122_v27 = vld [vmem:[%s3915_s12 + $0x4] ss:$8 sps:$4 sm:$0xff] (!%p1411_p13)   ;;  %v3120_v45 = vld [vmem:[%s3915_s12] ss:$8 sps:$4 sm:$0xff] (!%p1411_p13)   ;;  %v1415_v13 = vld [vmem:[#allocation2] sm:$0xff] (!%p1411_p13) }
 0x390   : > { %1414 = sbr.rel (%p1411_p13) target bundleno = 1228 (0x4cc), region = 92  ;;  %1690 = vmatprep.mubr.bf16.mxu0 (!%p1411_p13), %v3122_v27  ;;  %v3125_v33 = vld [vmem:[%s3915_s12 + $0x84] ss:$8 sps:$4 sm:$0xff] (!%p1411_p13)   ;;  %v3123_v46 = vld [vmem:[%s3915_s12 + $0x80] ss:$8 sps:$4 sm:$0xff] (!%p1411_p13)   ;;  %v1431_v15 = vld [vmem:[#allocation2 + $0x80] sm:$0xff] (!%p1411_p13) }
 0x391   : > { %1754 = vmatprep.mubr.bf16.mxu1 (!%p1411_p13), %v3125_v33  ;;  %v3126_v47 = vld [vmem:[%s3915_s12 + $0x14] ss:$8 sps:$4 sm:$0xff] (!%p1411_p13)   ;;  %v3130_v49 = vld [vmem:[%s3915_s12 + $0x10] ss:$8 sps:$4 sm:$0xff] (!%p1411_p13)   ;;  %v3132_v51 = vld [vmem:[%s3915_s12 + $0x24] ss:$8 sps:$4 sm:$0xff] (!%p1411_p13)  }
 0x392   : > { %v3128_v48 = vld [vmem:[%s3915_s12 + $0x94] ss:$8 sps:$4 sm:$0xff] (!%p1411_p13)   ;;  %v3131_v50 = vld [vmem:[%s3915_s12 + $0x90] ss:$8 sps:$4 sm:$0xff] (!%p1411_p13)   ;;  %v3134_v52 = vld [vmem:[%s3915_s12 + $0xa4] ss:$8 sps:$4 sm:$0xff] (!%p1411_p13)  }
 0x393   : > { %v3136_v53 = vld [vmem:[%s3915_s12 + $0x20] ss:$8 sps:$4 sm:$0xff] (!%p1411_p13)   ;;  %v3138_v55 = vld [vmem:[%s3915_s12 + $0x34] ss:$8 sps:$4 sm:$0xff] (!%p1411_p13)   ;;  %v3142_v57 = vld [vmem:[%s3915_s12 + $0x30] ss:$8 sps:$4 sm:$0xff] (!%p1411_p13)  }
 0x394   : > { %v3137_v54 = vld [vmem:[%s3915_s12 + $0xa0] ss:$8 sps:$4 sm:$0xff] (!%p1411_p13)   ;;  %v3140_v56 = vld [vmem:[%s3915_s12 + $0xb4] ss:$8 sps:$4 sm:$0xff] (!%p1411_p13)   ;;  %v3143_v58 = vld [vmem:[%s3915_s12 + $0xb0] ss:$8 sps:$4 sm:$0xff] (!%p1411_p13)  }
 0x395   : > { %s2466_s8 = sshll.u32 (!%p1411_p13), %s4359_s24, 7  ;;  %v3144_v59 = vld [vmem:[%s3915_s12 + $0x44] ss:$8 sps:$4 sm:$0xff] (!%p1411_p13)   ;;  %v3148_v61 = vld [vmem:[%s3915_s12 + $0x40] ss:$8 sps:$4 sm:$0xff] (!%p1411_p13)  }
 0x396   : > { %s4058_s23 = scalar_lea.vmem (!%p1411_p13), [#allocation3], %s2466_s8  ;;  %v3146_v60 = vld [vmem:[%s3915_s12 + $0xc4] ss:$8 sps:$4 sm:$0xff] (!%p1411_p13)   ;;  %v3149_v62 = vld [vmem:[%s3915_s12 + $0xc0] ss:$8 sps:$4 sm:$0xff] (!%p1411_p13)  }
 0x397   : > { %v1490_v28 = vld [vmem:[%s4058_s23 + $0x40] sm:$0xff]  ;;  %v1491_v30 = vld [vmem:[%s4058_s23 + $0x48] sm:$0xff]  ;;  %v1492_v32 = vld [vmem:[%s4058_s23 + $0x50] sm:$0xff] }
 0x398   : > { %v1482_v29 = vld [vmem:[%s4058_s23] sm:$0xff]  ;;  %2604 = vmatprep.subr.bf16.mxu0 %v1490_v28  ;;  %2863 = vmatprep.subr.bf16.mxu1 %v1490_v28  ;;  %v1483_v31 = vld [vmem:[%s4058_s23 + $0x8] sm:$0xff]  ;;  %v1484_v34 = vld [vmem:[%s4058_s23 + $0x10] sm:$0xff] }
 0x399   : > { %2605 = vmatpush3.bf16.msra.mxu0 %v1482_v29  ;;  %2871 = vmatpush3.bf16.msra.mxu1 %v1482_v29  ;;  %v1493_v35 = vld [vmem:[%s4058_s23 + $0x58] sm:$0xff]  ;;  %v1494_v37 = vld [vmem:[%s4058_s23 + $0x60] sm:$0xff]  ;;  %v1495_v39 = vld [vmem:[%s4058_s23 + $0x68] sm:$0xff] }
 0x39a   : > { %2606 = vmatprep.subr.bf16.mxu0 %v1491_v30  ;;  %2864 = vmatprep.subr.bf16.mxu1 %v1491_v30  ;;  %v1485_v36 = vld [vmem:[%s4058_s23 + $0x18] sm:$0xff]  ;;  %v1486_v38 = vld [vmem:[%s4058_s23 + $0x20] sm:$0xff]  ;;  %v1487_v40 = vld [vmem:[%s4058_s23 + $0x28] sm:$0xff] }
 0x39b   : > { %v1496_v41 = vld [vmem:[%s4058_s23 + $0x70] sm:$0xff]  ;;  %v1497_v43 = vld [vmem:[%s4058_s23 + $0x78] sm:$0xff]  ;;  %v1416_v21 = vld [vmem:[#allocation2 + $0x8] sm:$0xff] }
 0x39c   : > { %v1488_v42 = vld [vmem:[%s4058_s23 + $0x30] sm:$0xff]  ;;  %v1489_v44 = vld [vmem:[%s4058_s23 + $0x38] sm:$0xff]  ;;  %v1432_v23 = vld [vmem:[#allocation2 + $0x88] sm:$0xff] }
 0x39d   : > { %2607 = vmatpush3.bf16.msra.mxu0 %v1483_v31  ;;  %2872 = vmatpush3.bf16.msra.mxu1 %v1483_v31  ;;  %v3150_v63 = vld [vmem:[%s3915_s12 + $0x54] ss:$8 sps:$4 sm:$0xff]   ;;  %v3154_v1 = vld [vmem:[%s3915_s12 + $0x50] ss:$8 sps:$4 sm:$0xff]   ;;  %v3156_v3 = vld [vmem:[%s3915_s12 + $0x64] ss:$8 sps:$4 sm:$0xff]  }
 0x39e   : > { %2608 = vmatprep.subr.bf16.mxu0 %v1492_v32  ;;  %2865 = vmatprep.subr.bf16.mxu1 %v1492_v32  ;;  %v3152_v0 = vld [vmem:[%s3915_s12 + $0xd4] ss:$8 sps:$4 sm:$0xff]   ;;  %v3155_v2 = vld [vmem:[%s3915_s12 + $0xd0] ss:$8 sps:$4 sm:$0xff]   ;;  %v3158_v4 = vld [vmem:[%s3915_s12 + $0xe4] ss:$8 sps:$4 sm:$0xff]  }
 0x39f   : > { %v3160_v5 = vld [vmem:[%s3915_s12 + $0x60] ss:$8 sps:$4 sm:$0xff]   ;;  %v3162_v7 = vld [vmem:[%s3915_s12 + $0x74] ss:$8 sps:$4 sm:$0xff]   ;;  %v3166_v9 = vld [vmem:[%s3915_s12 + $0x70] ss:$8 sps:$4 sm:$0xff]  }
 0x3a0   : > { %v3161_v6 = vld [vmem:[%s3915_s12 + $0xe0] ss:$8 sps:$4 sm:$0xff]   ;;  %v3164_v8 = vld [vmem:[%s3915_s12 + $0xf4] ss:$8 sps:$4 sm:$0xff]   ;;  %v3167_v10 = vld [vmem:[%s3915_s12 + $0xf0] ss:$8 sps:$4 sm:$0xff]  }
 0x3a1   : > { %2609 = vmatpush3.bf16.msra.mxu0 %v1484_v34  ;;  %2873 = vmatpush3.bf16.msra.mxu1 %v1484_v34  ;;  %v1417_v33 = vld [vmem:[#allocation2 + $0x10] sm:$0xff] }
 0x3a2   : > { %2610 = vmatprep.subr.bf16.mxu0 %v1493_v35  ;;  %2866 = vmatprep.subr.bf16.mxu1 %v1493_v35  ;;  %v1433_v35 = vld [vmem:[#allocation2 + $0x90] sm:$0xff] }
 0x3a5   : > { %2611 = vmatpush3.bf16.msra.mxu0 %v1485_v36  ;;  %2874 = vmatpush3.bf16.msra.mxu1 %v1485_v36 }
 0x3a6   : > { %2612 = vmatprep.subr.bf16.mxu0 %v1494_v37  ;;  %2867 = vmatprep.subr.bf16.mxu1 %v1494_v37 }
 0x3a9   : > { %2613 = vmatpush3.bf16.msra.mxu0 %v1486_v38  ;;  %2875 = vmatpush3.bf16.msra.mxu1 %v1486_v38 }
 0x3aa   : > { %2614 = vmatprep.subr.bf16.mxu0 %v1495_v39  ;;  %2868 = vmatprep.subr.bf16.mxu1 %v1495_v39 }
 0x3ad   : > { %2615 = vmatpush3.bf16.msra.mxu0 %v1487_v40  ;;  %2876 = vmatpush3.bf16.msra.mxu1 %v1487_v40 }
 0x3ae   : > { %2616 = vmatprep.subr.bf16.mxu0 %v1496_v41  ;;  %2869 = vmatprep.subr.bf16.mxu1 %v1496_v41  ;;  %v1418_v41 = vld [vmem:[#allocation2 + $0x18] sm:$0xff] }
 0x3b1   : > { %2617 = vmatpush3.bf16.msra.mxu0 %v1488_v42  ;;  %2877 = vmatpush3.bf16.msra.mxu1 %v1488_v42 }
 0x3b2   : > { %2618 = vmatprep.subr.bf16.mxu0 %v1497_v43  ;;  %2870 = vmatprep.subr.bf16.mxu1 %v1497_v43  ;;  %v1434_v43 = vld [vmem:[#allocation2 + $0x98] sm:$0xff] }
 0x3b5   : > { %2619 = vmatpush3.bf16.msra.mxu0 %v1489_v44  ;;  %2878 = vmatpush3.bf16.msra.mxu1 %v1489_v44 }
 0x3b8   : > { %1691 = vmatmul.mubr.bf16.vlgmr.msra.gmra.mrb[0].mxu0 %v3120_v45  ;;  %1755 = vmatmul.mubr.bf16.vlgmr.msra.gmra.mrb[0].mxu1 %v3123_v46 }
 0x3b9   : > { %1698 = vmatprep.mubr.bf16.mxu0 %v3126_v47  ;;  %1762 = vmatprep.mubr.bf16.mxu1 %v3128_v48 }
 0x3c0   : > { %1699 = vmatmul.mubr.bf16.gmra.mrb[4].mxu0 %v3130_v49  ;;  %1763 = vmatmul.mubr.bf16.gmra.mrb[4].mxu1 %v3131_v50 }
 0x3c1   : > { %1706 = vmatprep.mubr.bf16.mxu0 %v3132_v51  ;;  %1770 = vmatprep.mubr.bf16.mxu1 %v3134_v52 }
 0x3c8   : > { %1707 = vmatmul.mubr.bf16.gmra.mrb[8].mxu0 %v3136_v53  ;;  %1771 = vmatmul.mubr.bf16.gmra.mrb[8].mxu1 %v3137_v54  ;;  %v1419_v53 = vld [vmem:[#allocation2 + $0x20] sm:$0xff] }
 0x3c9   : > { %1714 = vmatprep.mubr.bf16.mxu0 %v3138_v55  ;;  %1778 = vmatprep.mubr.bf16.mxu1 %v3140_v56  ;;  %v1435_v55 = vld [vmem:[#allocation2 + $0xa0] sm:$0xff] }
 0x3d0   : > { %1715 = vmatmul.mubr.bf16.gmra.mrb[12].mxu0 %v3142_v57  ;;  %1779 = vmatmul.mubr.bf16.gmra.mrb[12].mxu1 %v3143_v58 }
 0x3d1   : > { %1722 = vmatprep.mubr.bf16.mxu0 %v3144_v59  ;;  %1786 = vmatprep.mubr.bf16.mxu1 %v3146_v60 }
 0x3d8   : > { %1723 = vmatmul.mubr.bf16.gmra.mrb[16].mxu0 %v3148_v61  ;;  %1787 = vmatmul.mubr.bf16.gmra.mrb[16].mxu1 %v3149_v62  ;;  %v1420_v61 = vld [vmem:[#allocation2 + $0x28] sm:$0xff] }
 0x3d9   : > { %1730 = vmatprep.mubr.bf16.mxu0 %v3150_v63  ;;  %1794 = vmatprep.mubr.bf16.mxu1 %v3152_v0  ;;  %v1436_v63 = vld [vmem:[#allocation2 + $0xa8] sm:$0xff] }
 0x3e0   : > { %1731 = vmatmul.mubr.bf16.gmra.mrb[20].mxu0 %v3154_v1  ;;  %1795 = vmatmul.mubr.bf16.gmra.mrb[20].mxu1 %v3155_v2 }
 0x3e1   : > { %1738 = vmatprep.mubr.bf16.mxu0 %v3156_v3  ;;  %1802 = vmatprep.mubr.bf16.mxu1 %v3158_v4 }
 0x3e8   : > { %1739 = vmatmul.mubr.bf16.gmra.mrb[24].mxu0 %v3160_v5  ;;  %1803 = vmatmul.mubr.bf16.gmra.mrb[24].mxu1 %v3161_v6 }
 0x3e9   : > { %1746 = vmatprep.mubr.bf16.mxu0 %v3162_v7  ;;  %1810 = vmatprep.mubr.bf16.mxu1 %v3164_v8 }
 0x3f0   : > { %1747 = vmatmul.mubr.bf16.gmra.mrb[28].mxu0 %v3166_v9  ;;  %1811 = vmatmul.mubr.bf16.gmra.mrb[28].mxu1 %v3167_v10  ;;  %v1421_v9 = vld [vmem:[#allocation2 + $0x30] sm:$0xff] }
 0x48b   : > { %v2620_v11 = vpop.f32.mrb[0].mxu0  ;;  %v2668_v12 = vpop.f32.mrb[0].mxu1 }
 0x48c   : > { %v2621_v14 = vpop.f32.mrb[1].mxu0  ;;  %v2669_v16 = vpop.f32.mrb[1].mxu1 }
 0x48d   : > { %v2622_v17 = vadd.f32 %v2621_v14, %v2620_v11  ;;  %v2670_v18 = vadd.f32 %v2669_v16, %v2668_v12  ;;  %v2623_v19 = vpop.f32.mrb[2].mxu0  ;;  %v2671_v20 = vpop.f32.mrb[2].mxu1  ;;  %v1437_v11 = vld [vmem:[#allocation2 + $0xb0] sm:$0xff] }
 0x48e   : > { %v2624_v22 = vpop.f32.mrb[3].mxu0  ;;  %v2672_v24 = vpop.f32.mrb[3].mxu1 }
 0x48f   : > { %v1819_v25 = vadd.f32 %v2622_v17, %v1415_v13  ;;  %v1835_v26 = vadd.f32 %v2670_v18, %v1431_v15  ;;  %v2625_v27 = vadd.f32 %v2624_v22, %v2623_v19  ;;  %v2673_v28 = vadd.f32 %v2672_v24, %v2671_v20  ;;  %v1422_v17 = vld [vmem:[#allocation2 + $0x38] sm:$0xff] }
 0x490   : > { %v1438_v19 = vld [vmem:[#allocation2 + $0xb8] sm:$0xff] }
 0x491   : > { %1851 = vst [vmem:[#allocation2] sm:$0xff] %v1819_v25  ;;  %1867 = vst [vmem:[#allocation2 + $0x80] sm:$0xff] %v1835_v26  ;;  %v1820_v29 = vadd.f32 %v2625_v27, %v1416_v21  ;;  %v1836_v30 = vadd.f32 %v2673_v28, %v1432_v23 }
 0x493   : > { %1852 = vst [vmem:[#allocation2 + $0x8] sm:$0xff] %v1820_v29  ;;  %1868 = vst [vmem:[#allocation2 + $0x88] sm:$0xff] %v1836_v30  ;;  %v2626_v31 = vpop.f32.mrb[4].mxu0  ;;  %v2674_v32 = vpop.f32.mrb[4].mxu1  ;;  %v1423_v29 = vld [vmem:[#allocation2 + $0x40] sm:$0xff] }
 0x494   : > { %v2627_v34 = vpop.f32.mrb[5].mxu0  ;;  %v2675_v36 = vpop.f32.mrb[5].mxu1 }
 0x495   : > { %v2628_v37 = vadd.f32 %v2627_v34, %v2626_v31  ;;  %v2676_v38 = vadd.f32 %v2675_v36, %v2674_v32  ;;  %v2629_v39 = vpop.f32.mrb[6].mxu0  ;;  %v2677_v40 = vpop.f32.mrb[6].mxu1  ;;  %v1439_v31 = vld [vmem:[#allocation2 + $0xc0] sm:$0xff] }
 0x496   : > { %v2630_v42 = vpop.f32.mrb[7].mxu0  ;;  %v2678_v44 = vpop.f32.mrb[7].mxu1 }
 0x497   : > { %v1821_v45 = vadd.f32 %v2628_v37, %v1417_v33  ;;  %v1837_v46 = vadd.f32 %v2676_v38, %v1433_v35  ;;  %v2631_v47 = vadd.f32 %v2630_v42, %v2629_v39  ;;  %v2679_v48 = vadd.f32 %v2678_v44, %v2677_v40  ;;  %v1424_v37 = vld [vmem:[#allocation2 + $0x48] sm:$0xff] }
 0x498   : > { %v1440_v39 = vld [vmem:[#allocation2 + $0xc8] sm:$0xff] }
 0x499   : > { %1853 = vst [vmem:[#allocation2 + $0x10] sm:$0xff] %v1821_v45  ;;  %1869 = vst [vmem:[#allocation2 + $0x90] sm:$0xff] %v1837_v46  ;;  %v1822_v49 = vadd.f32 %v2631_v47, %v1418_v41  ;;  %v1838_v50 = vadd.f32 %v2679_v48, %v1434_v43 }
 0x49b   : > { %1854 = vst [vmem:[#allocation2 + $0x18] sm:$0xff] %v1822_v49  ;;  %1870 = vst [vmem:[#allocation2 + $0x98] sm:$0xff] %v1838_v50  ;;  %v2632_v51 = vpop.f32.mrb[8].mxu0  ;;  %v2680_v52 = vpop.f32.mrb[8].mxu1  ;;  %v1425_v49 = vld [vmem:[#allocation2 + $0x50] sm:$0xff] }
 0x49c   : > { %v2633_v54 = vpop.f32.mrb[9].mxu0  ;;  %v2681_v56 = vpop.f32.mrb[9].mxu1 }
 0x49d   : > { %v2634_v57 = vadd.f32 %v2633_v54, %v2632_v51  ;;  %v2682_v58 = vadd.f32 %v2681_v56, %v2680_v52  ;;  %v2635_v59 = vpop.f32.mrb[10].mxu0  ;;  %v2683_v60 = vpop.f32.mrb[10].mxu1  ;;  %v1441_v51 = vld [vmem:[#allocation2 + $0xd0] sm:$0xff] }
 0x49e   : > { %v2636_v62 = vpop.f32.mrb[11].mxu0  ;;  %v2684_v0 = vpop.f32.mrb[11].mxu1 }
 0x49f   : > { %v1823_v1 = vadd.f32 %v2634_v57, %v1419_v53  ;;  %v1839_v2 = vadd.f32 %v2682_v58, %v1435_v55  ;;  %v2637_v3 = vadd.f32 %v2636_v62, %v2635_v59  ;;  %v2685_v4 = vadd.f32 %v2684_v0, %v2683_v60  ;;  %v1426_v57 = vld [vmem:[#allocation2 + $0x58] sm:$0xff] }
 0x4a0   : > { %v1442_v59 = vld [vmem:[#allocation2 + $0xd8] sm:$0xff] }
 0x4a1   : > { %1855 = vst [vmem:[#allocation2 + $0x20] sm:$0xff] %v1823_v1  ;;  %1871 = vst [vmem:[#allocation2 + $0xa0] sm:$0xff] %v1839_v2  ;;  %v1824_v5 = vadd.f32 %v2637_v3, %v1420_v61  ;;  %v1840_v6 = vadd.f32 %v2685_v4, %v1436_v63 }
 0x4a3   : > { %1856 = vst [vmem:[#allocation2 + $0x28] sm:$0xff] %v1824_v5  ;;  %1872 = vst [vmem:[#allocation2 + $0xa8] sm:$0xff] %v1840_v6  ;;  %v2638_v7 = vpop.f32.mrb[12].mxu0  ;;  %v2686_v8 = vpop.f32.mrb[12].mxu1  ;;  %v1427_v5 = vld [vmem:[#allocation2 + $0x60] sm:$0xff] }
 0x4a4   : > { %v2639_v10 = vpop.f32.mrb[13].mxu0  ;;  %v2687_v12 = vpop.f32.mrb[13].mxu1 }
 0x4a5   : > { %v2640_v13 = vadd.f32 %v2639_v10, %v2638_v7  ;;  %v2688_v14 = vadd.f32 %v2687_v12, %v2686_v8  ;;  %v2641_v15 = vpop.f32.mrb[14].mxu0  ;;  %v2689_v16 = vpop.f32.mrb[14].mxu1  ;;  %v1443_v7 = vld [vmem:[#allocation2 + $0xe0] sm:$0xff] }
 0x4a6   : > { %v2642_v18 = vpop.f32.mrb[15].mxu0  ;;  %v2690_v20 = vpop.f32.mrb[15].mxu1 }
 0x4a7   : > { %v1825_v21 = vadd.f32 %v2640_v13, %v1421_v9  ;;  %v1841_v22 = vadd.f32 %v2688_v14, %v1437_v11  ;;  %v2643_v23 = vadd.f32 %v2642_v18, %v2641_v15  ;;  %v2691_v24 = vadd.f32 %v2690_v20, %v2689_v16  ;;  %v1428_v13 = vld [vmem:[#allocation2 + $0x68] sm:$0xff] }
 0x4a8   : > { %v1444_v15 = vld [vmem:[#allocation2 + $0xe8] sm:$0xff] }
 0x4a9   : > { %1857 = vst [vmem:[#allocation2 + $0x30] sm:$0xff] %v1825_v21  ;;  %1873 = vst [vmem:[#allocation2 + $0xb0] sm:$0xff] %v1841_v22  ;;  %v1826_v25 = vadd.f32 %v2643_v23, %v1422_v17  ;;  %v1842_v26 = vadd.f32 %v2691_v24, %v1438_v19 }
 0x4ab   : > { %1858 = vst [vmem:[#allocation2 + $0x38] sm:$0xff] %v1826_v25  ;;  %1874 = vst [vmem:[#allocation2 + $0xb8] sm:$0xff] %v1842_v26  ;;  %v2644_v27 = vpop.f32.mrb[16].mxu0  ;;  %v2692_v28 = vpop.f32.mrb[16].mxu1  ;;  %v1429_v25 = vld [vmem:[#allocation2 + $0x70] sm:$0xff] }
 0x4ac   : > { %v2645_v30 = vpop.f32.mrb[17].mxu0  ;;  %v2693_v32 = vpop.f32.mrb[17].mxu1 }
 0x4ad   : > { %v2646_v33 = vadd.f32 %v2645_v30, %v2644_v27  ;;  %v2694_v34 = vadd.f32 %v2693_v32, %v2692_v28  ;;  %v2647_v35 = vpop.f32.mrb[18].mxu0  ;;  %v2695_v36 = vpop.f32.mrb[18].mxu1  ;;  %v1445_v27 = vld [vmem:[#allocation2 + $0xf0] sm:$0xff] }
 0x4ae   : > { %v2648_v38 = vpop.f32.mrb[19].mxu0  ;;  %v2696_v40 = vpop.f32.mrb[19].mxu1 }
 0x4af   : > { %v1827_v41 = vadd.f32 %v2646_v33, %v1423_v29  ;;  %v1843_v42 = vadd.f32 %v2694_v34, %v1439_v31  ;;  %v2649_v43 = vadd.f32 %v2648_v38, %v2647_v35  ;;  %v2697_v44 = vadd.f32 %v2696_v40, %v2695_v36  ;;  %v1430_v33 = vld [vmem:[#allocation2 + $0x78] sm:$0xff] }
 0x4b0   : > { %v1446_v35 = vld [vmem:[#allocation2 + $0xf8] sm:$0xff] }
 0x4b1   : > { %1859 = vst [vmem:[#allocation2 + $0x40] sm:$0xff] %v1827_v41  ;;  %1875 = vst [vmem:[#allocation2 + $0xc0] sm:$0xff] %v1843_v42  ;;  %v1828_v45 = vadd.f32 %v2649_v43, %v1424_v37  ;;  %v1844_v46 = vadd.f32 %v2697_v44, %v1440_v39 }
 0x4b3   : > { %1860 = vst [vmem:[#allocation2 + $0x48] sm:$0xff] %v1828_v45  ;;  %1876 = vst [vmem:[#allocation2 + $0xc8] sm:$0xff] %v1844_v46  ;;  %v2650_v47 = vpop.f32.mrb[20].mxu0  ;;  %v2698_v48 = vpop.f32.mrb[20].mxu1 }
 0x4b4   : > { %v2651_v50 = vpop.f32.mrb[21].mxu0  ;;  %v2699_v52 = vpop.f32.mrb[21].mxu1 }
 0x4b5   : > { %v2652_v53 = vadd.f32 %v2651_v50, %v2650_v47  ;;  %v2700_v54 = vadd.f32 %v2699_v52, %v2698_v48  ;;  %v2653_v55 = vpop.f32.mrb[22].mxu0  ;;  %v2701_v56 = vpop.f32.mrb[22].mxu1 }
 0x4b6   : > { %v2654_v58 = vpop.f32.mrb[23].mxu0  ;;  %v2702_v60 = vpop.f32.mrb[23].mxu1 }
 0x4b7   : > { %v1829_v61 = vadd.f32 %v2652_v53, %v1425_v49  ;;  %v1845_v62 = vadd.f32 %v2700_v54, %v1441_v51  ;;  %v2655_v63 = vadd.f32 %v2654_v58, %v2653_v55  ;;  %v2703_v0 = vadd.f32 %v2702_v60, %v2701_v56 }
 0x4b9   : > { %1861 = vst [vmem:[#allocation2 + $0x50] sm:$0xff] %v1829_v61  ;;  %1877 = vst [vmem:[#allocation2 + $0xd0] sm:$0xff] %v1845_v62  ;;  %v1830_v1 = vadd.f32 %v2655_v63, %v1426_v57  ;;  %v1846_v2 = vadd.f32 %v2703_v0, %v1442_v59 }
 0x4bb   : > { %1862 = vst [vmem:[#allocation2 + $0x58] sm:$0xff] %v1830_v1  ;;  %1878 = vst [vmem:[#allocation2 + $0xd8] sm:$0xff] %v1846_v2  ;;  %v2656_v3 = vpop.f32.mrb[24].mxu0  ;;  %v2704_v4 = vpop.f32.mrb[24].mxu1 }
 0x4bc   : > { %v2657_v6 = vpop.f32.mrb[25].mxu0  ;;  %v2705_v8 = vpop.f32.mrb[25].mxu1 }
 0x4bd   : > { %v2658_v9 = vadd.f32 %v2657_v6, %v2656_v3  ;;  %v2706_v10 = vadd.f32 %v2705_v8, %v2704_v4  ;;  %v2659_v11 = vpop.f32.mrb[26].mxu0  ;;  %v2707_v12 = vpop.f32.mrb[26].mxu1 }
 0x4be   : > { %v2660_v14 = vpop.f32.mrb[27].mxu0  ;;  %v2708_v16 = vpop.f32.mrb[27].mxu1 }
 0x4bf   : > { %v1831_v17 = vadd.f32 %v2658_v9, %v1427_v5  ;;  %v1847_v18 = vadd.f32 %v2706_v10, %v1443_v7  ;;  %v2661_v19 = vadd.f32 %v2660_v14, %v2659_v11  ;;  %v2709_v20 = vadd.f32 %v2708_v16, %v2707_v12 }
 0x4c1   : > { %1863 = vst [vmem:[#allocation2 + $0x60] sm:$0xff] %v1831_v17  ;;  %1879 = vst [vmem:[#allocation2 + $0xe0] sm:$0xff] %v1847_v18  ;;  %v1832_v21 = vadd.f32 %v2661_v19, %v1428_v13  ;;  %v1848_v22 = vadd.f32 %v2709_v20, %v1444_v15 }
 0x4c3   : > { %1864 = vst [vmem:[#allocation2 + $0x68] sm:$0xff] %v1832_v21  ;;  %1880 = vst [vmem:[#allocation2 + $0xe8] sm:$0xff] %v1848_v22  ;;  %v2662_v23 = vpop.f32.mrb[28].mxu0  ;;  %v2710_v24 = vpop.f32.mrb[28].mxu1 }
 0x4c4   : > { %v2663_v26 = vpop.f32.mrb[29].mxu0  ;;  %v2711_v28 = vpop.f32.mrb[29].mxu1 }
 0x4c5   : > { %v2664_v29 = vadd.f32 %v2663_v26, %v2662_v23  ;;  %v2712_v30 = vadd.f32 %v2711_v28, %v2710_v24  ;;  %v2665_v31 = vpop.f32.mrb[30].mxu0  ;;  %v2713_v32 = vpop.f32.mrb[30].mxu1 }
 0x4c6   : > { %v2666_v34 = vpop.f32.mrb[31].mxu0  ;;  %v2714_v36 = vpop.f32.mrb[31].mxu1 }
 0x4c7   : > { %v1833_v37 = vadd.f32 %v2664_v29, %v1429_v25  ;;  %v1849_v38 = vadd.f32 %v2712_v30, %v1445_v27  ;;  %v2667_v39 = vadd.f32 %v2666_v34, %v2665_v31  ;;  %v2715_v40 = vadd.f32 %v2714_v36, %v2713_v32 }
 0x4c9   : > { %1865 = vst [vmem:[#allocation2 + $0x70] sm:$0xff] %v1833_v37  ;;  %1881 = vst [vmem:[#allocation2 + $0xf0] sm:$0xff] %v1849_v38  ;;  %v1834_v41 = vadd.f32 %v2667_v39, %v1430_v33  ;;  %v1850_v42 = vadd.f32 %v2715_v40, %v1446_v35 }
 0x4cb   : > { %1866 = vst [vmem:[#allocation2 + $0x78] sm:$0xff] %v1834_v41  ;;  %1882 = vst [vmem:[#allocation2 + $0xf8] sm:$0xff] %v1850_v42 }
 0x4cc PF: > { %s4360_s12 = sld [smem:[#allocation29_spill]] }
 0x4d2   : > { %p1883_p3 = scmp.eq.s32.totalorder %s4360_s12, 1 }
 0x4d4   : > { %p1884_p5 = pnand %p1883_p3, %p500_p10 }
 0x4d5   : > { %v1888_v43 = vld [vmem:[#allocation2] sm:$0xff] (!%p1884_p5)  ;;  %s4362_s13 = sld [smem:[#allocation30_spill]] (!%p1884_p5)  ;;  %v1889_v44 = vld [vmem:[#allocation2 + $0x8] sm:$0xff] (!%p1884_p5)  ;;  %v1890_v48 = vld [vmem:[#allocation2 + $0x10] sm:$0xff] (!%p1884_p5) }
 0x4d6   : > { %1887 = sbr.rel (%p1884_p5) target bundleno = 1263 (0x4ef), region = 96  ;;  %v4112_v45 = vld [vmem:[#allocation14] ss:$0 sm:$0xff] (!%p1884_p5)  ;;  %v1891_v49 = vld [vmem:[#allocation2 + $0x18] sm:$0xff] (!%p1884_p5)  ;;  %v1892_v50 = vld [vmem:[#allocation2 + $0x20] sm:$0xff] (!%p1884_p5) }
 0x4d7   : > { %v1927_v46 = vadd.f32 (!%p1884_p5), %v4112_v45, %v1888_v43  ;;  %v1928_v47 = vadd.f32 (!%p1884_p5), %v4112_v45, %v1889_v44  ;;  %v1929_v51 = vadd.f32 (!%p1884_p5), %v4112_v45, %v1890_v48  ;;  %v1930_v52 = vadd.f32 (!%p1884_p5), %v4112_v45, %v1891_v49  ;;  %v1893_v53 = vld [vmem:[#allocation2 + $0x28] sm:$0xff] (!%p1884_p5)  ;;  %v1894_v55 = vld [vmem:[#allocation2 + $0x30] sm:$0xff] (!%p1884_p5)  ;;  %v1895_v56 = vld [vmem:[#allocation2 + $0x38] sm:$0xff] (!%p1884_p5) }
 0x4d8   : > { %v1931_v54 = vadd.f32 (!%p1884_p5), %v4112_v45, %v1892_v50  ;;  %v1932_v59 = vadd.f32 (!%p1884_p5), %v4112_v45, %v1893_v53  ;;  %v1933_v60 = vadd.f32 (!%p1884_p5), %v4112_v45, %v1894_v55  ;;  %v1896_v61 = vld [vmem:[#allocation2 + $0x40] sm:$0xff] (!%p1884_p5)  ;;  %v1897_v62 = vld [vmem:[#allocation2 + $0x48] sm:$0xff] (!%p1884_p5)  ;;  %v1898_v63 = vld [vmem:[#allocation2 + $0x50] sm:$0xff] (!%p1884_p5)  ;;  %v1934_v3 = vadd.f32 (!%p1884_p5), %v4112_v45, %v1895_v56 }
 0x4d9   : > { %v1959_v57 = vmax.f32 (!%p1884_p5), %v1927_v46, 0.0  ;;  %v1960_v58 = vmax.f32 (!%p1884_p5), %v1928_v47, 0.0  ;;  %v1961_v0 = vmax.f32 (!%p1884_p5), %v1929_v51, 0.0  ;;  %v1962_v1 = vmax.f32 (!%p1884_p5), %v1930_v52, 0.0  ;;  %v1899_v4 = vld [vmem:[#allocation2 + $0x58] sm:$0xff] (!%p1884_p5)  ;;  %v1900_v5 = vld [vmem:[#allocation2 + $0x60] sm:$0xff] (!%p1884_p5) }
 0x4da   : > { %v1963_v2 = vmax.f32 (!%p1884_p5), %v1931_v54, 0.0  ;;  %v1964_v7 = vmax.f32 (!%p1884_p5), %v1932_v59, 0.0  ;;  %v1965_v8 = vmax.f32 (!%p1884_p5), %v1933_v60, 0.0  ;;  %v1935_v9 = vadd.f32 (!%p1884_p5), %v4112_v45, %v1896_v61  ;;  %v1901_v10 = vld [vmem:[#allocation2 + $0x68] sm:$0xff] (!%p1884_p5)  ;;  %v1902_v15 = vld [vmem:[#allocation2 + $0x70] sm:$0xff] (!%p1884_p5)  ;;  %v1903_v16 = vld [vmem:[#allocation2 + $0x78] sm:$0xff] (!%p1884_p5) }
 0x4db   : > { %s2467_s29 = sshll.u32 (!%p1884_p5), %s4362_s13, 7  ;;  %v1991_v6 = vpack.c.bf16 (!%p1884_p5), %v1960_v58, %v1959_v57  ;;  %v1992_v11 = vpack.c.bf16 (!%p1884_p5), %v1962_v1, %v1961_v0  ;;  %v1966_v12 = vmax.f32 (!%p1884_p5), %v1934_v3, 0.0  ;;  %v1936_v13 = vadd.f32 (!%p1884_p5), %v4112_v45, %v1897_v62  ;;  %v1904_v21 = vld [vmem:[#allocation2 + $0x80] sm:$0xff] (!%p1884_p5)  ;;  %v1905_v22 = vld [vmem:[#allocation2 + $0x88] sm:$0xff] (!%p1884_p5)  ;;  %v1906_v27 = vld [vmem:[#allocation2 + $0x90] sm:$0xff] (!%p1884_p5) }
 0x4dc   : > { %v1937_v14 = vadd.f32 (!%p1884_p5), %v4112_v45, %v1898_v63  ;;  %s4128_s26 = scalar_lea.vmem (!%p1884_p5), [#allocation3], %s2467_s29  ;;  %v1993_v17 = vpack.c.bf16 (!%p1884_p5), %v1964_v7, %v1963_v2  ;;  %v1967_v18 = vmax.f32 (!%p1884_p5), %v1935_v9, 0.0  ;;  %v1938_v19 = vadd.f32 (!%p1884_p5), %v4112_v45, %v1899_v4  ;;  %v1907_v32 = vld [vmem:[#allocation2 + $0x98] sm:$0xff] (!%p1884_p5)  ;;  %v1908_v37 = vld [vmem:[#allocation2 + $0xa0] sm:$0xff] (!%p1884_p5)  ;;  %v1909_v38 = vld [vmem:[#allocation2 + $0xa8] sm:$0xff] (!%p1884_p5) }
 0x4dd   : > { %2010 = vst [vmem:[%s4128_s26] sm:$0xff] %v1991_v6  ;;  %v1939_v20 = vadd.f32 %v4112_v45, %v1900_v5  ;;  %2011 = vst [vmem:[%s4128_s26 + $0x8] sm:$0xff] %v1992_v11  ;;  %v1994_v23 = vpack.c.bf16 %v1966_v12, %v1965_v8  ;;  %v1968_v24 = vmax.f32 %v1936_v13, 0.0  ;;  %v1940_v26 = vadd.f32 %v4112_v45, %v1901_v10  ;;  %v1910_v43 = vld [vmem:[#allocation2 + $0xb0] sm:$0xff]  ;;  %v1911_v44 = vld [vmem:[#allocation2 + $0xb8] sm:$0xff] }
 0x4de   : > { %v1969_v25 = vmax.f32 %v1937_v14, 0.0  ;;  %2012 = vst [vmem:[%s4128_s26 + $0x10] sm:$0xff] %v1993_v17  ;;  %v1970_v28 = vmax.f32 %v1938_v19, 0.0  ;;  %v1941_v30 = vadd.f32 %v4112_v45, %v1902_v15  ;;  %v1942_v31 = vadd.f32 %v4112_v45, %v1903_v16  ;;  %v1912_v50 = vld [vmem:[#allocation2 + $0xc0] sm:$0xff]  ;;  %v1913_v51 = vld [vmem:[#allocation2 + $0xc8] sm:$0xff]  ;;  %v1914_v56 = vld [vmem:[#allocation2 + $0xd0] sm:$0xff] }
 0x4df   : > { %v1971_v29 = vmax.f32 %v1939_v20, 0.0  ;;  %2013 = vst [vmem:[%s4128_s26 + $0x18] sm:$0xff] %v1994_v23  ;;  %v1995_v33 = vpack.c.bf16 %v1968_v24, %v1967_v18  ;;  %v1972_v34 = vmax.f32 %v1940_v26, 0.0  ;;  %v1943_v35 = vadd.f32 %v4112_v45, %v1904_v21  ;;  %v1915_v61 = vld [vmem:[#allocation2 + $0xd8] sm:$0xff]  ;;  %v1916_v2 = vld [vmem:[#allocation2 + $0xe0] sm:$0xff]  ;;  %v1917_v3 = vld [vmem:[#allocation2 + $0xe8] sm:$0xff] }
 0x4e0   : > { %v1944_v36 = vadd.f32 %v4112_v45, %v1905_v22  ;;  %v1996_v39 = vpack.c.bf16 %v1970_v28, %v1969_v25  ;;  %v1973_v40 = vmax.f32 %v1941_v30, 0.0  ;;  %v1974_v41 = vmax.f32 %v1942_v31, 0.0  ;;  %v1918_v8 = vld [vmem:[#allocation2 + $0xf0] sm:$0xff]  ;;  %v1919_v9 = vld [vmem:[#allocation2 + $0xf8] sm:$0xff] }
 0x4e1   : > { %v1945_v42 = vadd.f32 %v4112_v45, %v1906_v27  ;;  %2014 = vst [vmem:[%s4128_s26 + $0x20] sm:$0xff] %v1995_v33  ;;  %v1997_v46 = vpack.c.bf16 %v1972_v34, %v1971_v29  ;;  %v1975_v47 = vmax.f32 %v1943_v35, 0.0  ;;  %v1946_v49 = vadd.f32 %v4112_v45, %v1907_v32 }
 0x4e2   : > { %v1976_v48 = vmax.f32 %v1944_v36, 0.0  ;;  %2015 = vst [vmem:[%s4128_s26 + $0x28] sm:$0xff] %v1996_v39  ;;  %v1998_v52 = vpack.c.bf16 %v1974_v41, %v1973_v40  ;;  %v1947_v54 = vadd.f32 %v4112_v45, %v1908_v37  ;;  %v1948_v55 = vadd.f32 %v4112_v45, %v1909_v38 }
 0x4e3   : > { %v1977_v53 = vmax.f32 %v1945_v42, 0.0  ;;  %2016 = vst [vmem:[%s4128_s26 + $0x30] sm:$0xff] %v1997_v46  ;;  %v1978_v58 = vmax.f32 %v1946_v49, 0.0  ;;  %v1949_v59 = vadd.f32 %v4112_v45, %v1910_v43  ;;  %v1950_v60 = vadd.f32 %v4112_v45, %v1911_v44 }
 0x4e4   : > { %v1999_v57 = vpack.c.bf16 %v1976_v48, %v1975_v47  ;;  %2017 = vst [vmem:[%s4128_s26 + $0x38] sm:$0xff] %v1998_v52  ;;  %v1979_v62 = vmax.f32 %v1947_v54, 0.0  ;;  %v1980_v63 = vmax.f32 %v1948_v55, 0.0  ;;  %v1951_v0 = vadd.f32 %v4112_v45, %v1912_v50 }
 0x4e5   : > { %v1952_v1 = vadd.f32 %v4112_v45, %v1913_v51  ;;  %v2000_v4 = vpack.c.bf16 %v1978_v58, %v1977_v53  ;;  %v1981_v5 = vmax.f32 %v1949_v59, 0.0  ;;  %v1982_v6 = vmax.f32 %v1950_v60, 0.0 }
 0x4e6   : > { %2018 = vst [vmem:[%s4128_s26 + $0x40] sm:$0xff] %v1999_v57  ;;  %v1953_v7 = vadd.f32 %v4112_v45, %v1914_v56  ;;  %v2001_v10 = vpack.c.bf16 %v1980_v63, %v1979_v62  ;;  %v1983_v11 = vmax.f32 %v1951_v0, 0.0  ;;  %v1954_v13 = vadd.f32 %v4112_v45, %v1915_v61 }
 0x4e7   : > { %v1984_v12 = vmax.f32 %v1952_v1, 0.0  ;;  %2019 = vst [vmem:[%s4128_s26 + $0x48] sm:$0xff] %v2000_v4  ;;  %v2002_v14 = vpack.c.bf16 %v1982_v6, %v1981_v5  ;;  %v1955_v16 = vadd.f32 %v4112_v45, %v1916_v2  ;;  %v1956_v17 = vadd.f32 %v4112_v45, %v1917_v3 }
 0x4e8   : > { %v1985_v15 = vmax.f32 %v1953_v7, 0.0  ;;  %2020 = vst [vmem:[%s4128_s26 + $0x50] sm:$0xff] %v2001_v10  ;;  %v1986_v19 = vmax.f32 %v1954_v13, 0.0  ;;  %v1957_v20 = vadd.f32 %v4112_v45, %v1918_v8  ;;  %v1958_v21 = vadd.f32 %v4112_v45, %v1919_v9 }
 0x4e9   : > { %v2003_v18 = vpack.c.bf16 %v1984_v12, %v1983_v11  ;;  %2021 = vst [vmem:[%s4128_s26 + $0x58] sm:$0xff] %v2002_v14  ;;  %v1987_v22 = vmax.f32 %v1955_v16, 0.0  ;;  %v1988_v23 = vmax.f32 %v1956_v17, 0.0 }
 0x4ea   : > { %v2004_v24 = vpack.c.bf16 %v1986_v19, %v1985_v15  ;;  %v1989_v25 = vmax.f32 %v1957_v20, 0.0  ;;  %v1990_v26 = vmax.f32 %v1958_v21, 0.0 }
 0x4eb   : > { %2022 = vst [vmem:[%s4128_s26 + $0x60] sm:$0xff] %v2003_v18  ;;  %v2005_v27 = vpack.c.bf16 %v1988_v23, %v1987_v22 }
 0x4ec   : > { %2023 = vst [vmem:[%s4128_s26 + $0x68] sm:$0xff] %v2004_v24  ;;  %v2006_v28 = vpack.c.bf16 %v1990_v26, %v1989_v25 }
 0x4ed   : > { %2024 = vst [vmem:[%s4128_s26 + $0x70] sm:$0xff] %v2005_v27 }
 0x4ee   : > { %2025 = vst [vmem:[%s4128_s26 + $0x78] sm:$0xff] %v2006_v28 }
 0x4ef PF: > { %p2026_p10 = pnand %p1883_p3, %p501_p8 }
 0x4f0   : > { %v2046_v45 = vld [vmem:[#allocation2 + $0x80] sm:$0xff] (!%p2026_p10)  ;;  %v2047_v29 = vld [vmem:[#allocation2 + $0x88] sm:$0xff] (!%p2026_p10)  ;;  %v2048_v35 = vld [vmem:[#allocation2 + $0x90] sm:$0xff] (!%p2026_p10) }
 0x4f1   : > { %2029 = sbr.rel (%p2026_p10) target bundleno = 1520 (0x5f0), region = 100  ;;  %v4171_v30 = vld [vmem:[#allocation17] ss:$0 sm:$0xff] (!%p2026_p10)  ;;  %v2030_v33 = vld [vmem:[#allocation2] sm:$0xff] (!%p2026_p10)  ;;  %v2049_v38 = vld [vmem:[#allocation2 + $0x98] sm:$0xff] (!%p2026_p10) }
 0x4f2   : > { %v2085_v31 = vadd.f32 (!%p2026_p10), %v4171_v30, %v2046_v45  ;;  %v2086_v32 = vadd.f32 (!%p2026_p10), %v4171_v30, %v2047_v29  ;;  %v2031_v34 = vld [vmem:[#allocation2 + $0x8] sm:$0xff] (!%p2026_p10)  ;;  %v2069_v36 = vadd.f32 (!%p2026_p10), %v4171_v30, %v2030_v33  ;;  %v2087_v39 = vadd.f32 (!%p2026_p10), %v4171_v30, %v2048_v35  ;;  %v2032_v40 = vld [vmem:[#allocation2 + $0x10] sm:$0xff] (!%p2026_p10)  ;;  %v2033_v41 = vld [vmem:[#allocation2 + $0x18] sm:$0xff] (!%p2026_p10) }
 0x4f3   : > { %v2070_v37 = vadd.f32 (!%p2026_p10), %v4171_v30, %v2031_v34  ;;  %v2088_v43 = vadd.f32 (!%p2026_p10), %v4171_v30, %v2049_v38  ;;  %v2071_v44 = vadd.f32 (!%p2026_p10), %v4171_v30, %v2032_v40  ;;  %v2072_v46 = vadd.f32 (!%p2026_p10), %v4171_v30, %v2033_v41  ;;  %v2050_v47 = vld [vmem:[#allocation2 + $0xa0] sm:$0xff] (!%p2026_p10)  ;;  %v2051_v48 = vld [vmem:[#allocation2 + $0xa8] sm:$0xff] (!%p2026_p10)  ;;  %v2052_v54 = vld [vmem:[#allocation2 + $0xb0] sm:$0xff] (!%p2026_p10) }
 0x4f4   : > { %v2799_v42 = vpack.c.bf16 (!%p2026_p10), %v2086_v32, %v2085_v31  ;;  %v2034_v49 = vld [vmem:[#allocation2 + $0x20] sm:$0xff] (!%p2026_p10)  ;;  %v2089_v51 = vadd.f32 (!%p2026_p10), %v4171_v30, %v2050_v47  ;;  %v2090_v52 = vadd.f32 (!%p2026_p10), %v4171_v30, %v2051_v48  ;;  %v2035_v53 = vld [vmem:[#allocation2 + $0x28] sm:$0xff] (!%p2026_p10)  ;;  %v2053_v55 = vld [vmem:[#allocation2 + $0xb8] sm:$0xff] (!%p2026_p10)  ;;  %v2091_v61 = vadd.f32 (!%p2026_p10), %v4171_v30, %v2052_v54 }
 0x4f5   : > { %v2801_v50 = vpack.c.bf16 (!%p2026_p10), %v2070_v37, %v2069_v36  ;;  %v2803_v56 = vpack.c.bf16 (!%p2026_p10), %v2088_v43, %v2087_v39  ;;  %v2805_v57 = vpack.c.bf16 (!%p2026_p10), %v2072_v46, %v2071_v44  ;;  %v2073_v58 = vadd.f32 (!%p2026_p10), %v4171_v30, %v2034_v49  ;;  %v2036_v63 = vld [vmem:[#allocation2 + $0x30] sm:$0xff] (!%p2026_p10)  ;;  %v2037_v0 = vld [vmem:[#allocation2 + $0x38] sm:$0xff] (!%p2026_p10)  ;;  %v2054_v1 = vld [vmem:[#allocation2 + $0xc0] sm:$0xff] (!%p2026_p10) }
 0x4f6   : > { %2800 = vmatprep.subr.bf16.mxu0 (!%p2026_p10), %v2799_v42  ;;  %v2074_v59 = vadd.f32 (!%p2026_p10), %v4171_v30, %v2035_v53  ;;  %v2807_v60 = vpack.c.bf16 (!%p2026_p10), %v2090_v52, %v2089_v51  ;;  %v2092_v62 = vadd.f32 (!%p2026_p10), %v4171_v30, %v2053_v55  ;;  %v2055_v2 = vld [vmem:[#allocation2 + $0xc8] sm:$0xff] (!%p2026_p10)  ;;  %v2075_v4 = vadd.f32 (!%p2026_p10), %v4171_v30, %v2036_v63  ;;  %v2038_v9 = vld [vmem:[#allocation2 + $0x40] sm:$0xff] (!%p2026_p10)  ;;  %v2056_v12 = vld [vmem:[#allocation2 + $0xd0] sm:$0xff] (!%p2026_p10) }
 0x4f7   : > { %2802 = vmatpush3.bf16.msra.mxu0 (!%p2026_p10), %v2801_v50  ;;  %v2076_v5 = vadd.f32 (!%p2026_p10), %v4171_v30, %v2037_v0  ;;  %v2093_v7 = vadd.f32 (!%p2026_p10), %v4171_v30, %v2054_v1  ;;  %v2094_v8 = vadd.f32 (!%p2026_p10), %v4171_v30, %v2055_v2  ;;  %v2039_v10 = vld [vmem:[#allocation2 + $0x48] sm:$0xff] (!%p2026_p10)  ;;  %v2057_v13 = vld [vmem:[#allocation2 + $0xd8] sm:$0xff] (!%p2026_p10)  ;;  %v2077_v15 = vadd.f32 (!%p2026_p10), %v4171_v30, %v2038_v9  ;;  %v2040_v20 = vld [vmem:[#allocation2 + $0x50] sm:$0xff] (!%p2026_p10) }
 0x4f8   : > { %2804 = vmatprep.subr.bf16.mxu0 %v2803_v56  ;;  %v2809_v3 = vpack.c.bf16 %v2074_v59, %v2073_v58  ;;  %v2811_v6 = vpack.c.bf16 %v2092_v62, %v2091_v61  ;;  %v2103_v11 = vld [vmem:[%s3955_s17 + $0x8] sm:$0xff]  ;;  %v2078_v16 = vadd.f32 %v4171_v30, %v2039_v10  ;;  %v2095_v18 = vadd.f32 %v4171_v30, %v2056_v12  ;;  %v2041_v21 = vld [vmem:[#allocation2 + $0x58] sm:$0xff]  ;;  %v2058_v22 = vld [vmem:[#allocation2 + $0xe0] sm:$0xff] }
 0x4f9   : > { %2168 = vmatprep.mubr.f32.mxu0 %v2103_v11  ;;  %v2813_v14 = vpack.c.bf16 %v2076_v5, %v2075_v4  ;;  %v2815_v17 = vpack.c.bf16 %v2094_v8, %v2093_v7  ;;  %v2096_v19 = vadd.f32 %v4171_v30, %v2057_v13  ;;  %v2059_v23 = vld [vmem:[#allocation2 + $0xe8] sm:$0xff]  ;;  %v2079_v25 = vadd.f32 %v4171_v30, %v2040_v20  ;;  %v2042_v29 = vld [vmem:[#allocation2 + $0x60] sm:$0xff]  ;;  %v2060_v32 = vld [vmem:[#allocation2 + $0xf0] sm:$0xff] }
 0x4fa   : > { %v2817_v24 = vpack.c.bf16 %v2078_v16, %v2077_v15  ;;  %v2080_v26 = vadd.f32 %v4171_v30, %v2041_v21  ;;  %v2097_v28 = vadd.f32 %v4171_v30, %v2058_v22  ;;  %v2098_v45 = vadd.f32 %v4171_v30, %v2059_v23  ;;  %v2043_v31 = vld [vmem:[#allocation2 + $0x68] sm:$0xff]  ;;  %v2061_v33 = vld [vmem:[#allocation2 + $0xf8] sm:$0xff]  ;;  %v2044_v40 = vld [vmem:[#allocation2 + $0x70] sm:$0xff] }
 0x4fb   : > { %2806 = vmatpush3.bf16.msra.mxu0 %v2805_v57  ;;  %v2819_v27 = vpack.c.bf16 %v2096_v19, %v2095_v18  ;;  %v2081_v35 = vadd.f32 %v4171_v30, %v2042_v29  ;;  %v2082_v36 = vadd.f32 %v4171_v30, %v2043_v31  ;;  %v2099_v38 = vadd.f32 %v4171_v30, %v2060_v32  ;;  %v2045_v41 = vld [vmem:[#allocation2 + $0x78] sm:$0xff]  ;;  %v2102_v48 = vld [vmem:[%s3955_s17] sm:$0xff] }
 0x4fc   : > { %2808 = vmatprep.subr.bf16.mxu0 %v2807_v60  ;;  %v2821_v34 = vpack.c.bf16 %v2080_v26, %v2079_v25  ;;  %v2823_v37 = vpack.c.bf16 %v2098_v45, %v2097_v28  ;;  %v2100_v39 = vadd.f32 %v4171_v30, %v2061_v33  ;;  %v2083_v43 = vadd.f32 %v4171_v30, %v2044_v40  ;;  %v2101_v50 = vld [vmem:[#allocation4] sm:$0xff] }
 0x4fd   : > { %v2825_v42 = vpack.c.bf16 %v2082_v36, %v2081_v35  ;;  %v2084_v44 = vadd.f32 %v4171_v30, %v2045_v41 }
 0x4fe   : > { %v2827_v46 = vpack.c.bf16 %v2100_v39, %v2099_v38 }
 0x4ff   : > { %2810 = vmatpush3.bf16.msra.mxu0 %v2809_v3  ;;  %v2829_v47 = vpack.c.bf16 %v2084_v44, %v2083_v43 }
 0x500   : > { %2812 = vmatprep.subr.bf16.mxu0 %v2811_v6 }
 0x503   : > { %2814 = vmatpush3.bf16.msra.mxu0 %v2813_v14 }
 0x504   : > { %2816 = vmatprep.subr.bf16.mxu0 %v2815_v17 }
 0x507   : > { %2818 = vmatpush3.bf16.msra.mxu0 %v2817_v24 }
 0x508   : > { %2820 = vmatprep.subr.bf16.mxu0 %v2819_v27 }
 0x50b   : > { %2822 = vmatpush3.bf16.msra.mxu0 %v2821_v34 }
 0x50c   : > { %2824 = vmatprep.subr.bf16.mxu0 %v2823_v37 }
 0x50f   : > { %2826 = vmatpush3.bf16.msra.mxu0 %v2825_v42 }
 0x510   : > { %2828 = vmatprep.subr.bf16.mxu0 %v2827_v46 }
 0x513   : > { %2830 = vmatpush3.bf16.msra.mxu0 %v2829_v47 }
 0x516   : > { %2169 = vmatmul.mubr.f32.vlgmr.msra.gmra.mrb[0].mxu0 %v2102_v48 }
 0x5e9   : > { %v2748_v49 = vpop.f32.mrb[0].mxu0 }
 0x5ea   : > { %v2749_v51 = vpop.f32.mrb[1].mxu0 }
 0x5eb   : > { %v2750_v52 = vadd.f32 %v2749_v51, %v2748_v49 }
 0x5ed   : > { %v2174_v53 = vadd.f32 %v2750_v52, %v2101_v50 }
 0x5ef   : > { %2175 = vst [vmem:[#allocation4] sm:$0xff] %v2174_v53 }
 0x5f0 PF: > { %s4365_s10 = sld [smem:[#allocation30_spill]] }
 0x5f6   : > { %p2176_p1 = scmp.eq.s32.totalorder %s4365_s10, 1 }
 0x5f8   : > { %p2177_p6 = pnand %p2176_p1, %p1883_p3 }
 0x5fa   : > { %p2178_p12 = pneg %p2177_p6 }
 0x5fc   : > { %p2179_p2 = pnand %p2178_p12, %p501_p8 }
 0x5fd   : > { %v2183_v30 = vld [vmem:[#allocation4] sm:$0xff] (!%p2179_p2)  ;;  %s4368_s20 = sld [smem:[#allocation43_spill]] (!%p2179_p2)  ;;  %v2460_v56 = vld [vmem:[#allocation9] ss:$0 sm:$0xff] (!%p2179_p2)  ;;  %vm2202_vm0 = vcmask (!%p2179_p2), 7168   ;;  %s4369_s2 = sld [smem:[#allocation44_spill]] (!%p2179_p2) }
 0x5fe   : > { %2182 = sbr.rel (%p2179_p2) target bundleno = 1687 (0x697), region = 104 }
 0x603   : > { %v2459_v54 = vld [vmem:[%s4368_s20] ss:$0 sm:$0xff] (!%p2179_p2) }
 0x604   : > { %v2191_v55 = vmul.f32 (!%p2179_p2), %v2459_v54, %v2183_v30 }
 0x606   : > { %2192 = vadd.xlane.f32.xlu0 %v2191_v55 }
 0x693   : > { %v2193_v57 = vpop.xlane.xlu0 %2192 }
 0x694   : > { %v2201_v58 = vadd.f32 %v2460_v56, %v2193_v57 }
 0x696   : > { %2203 = vst.msk [vmem:[%s4369_s2] sm:$0xff] %vm2202_vm0, %v2201_v58 }
 0x697 PF: > { %s42_s1 = sadd.s32 1, %s3466_s1   ;;  %s4371_s2 = sld [smem:[#allocation32_spill]] }
 0x698   : > { %p4219_p8 = scmp.ge.s32.totalorder %s42_s1, 10   ;;  %s4372_s23 = sld [smem:[#allocation33_spill]] }
 0x699   : > { %s4373_s8 = sld [smem:[#allocation37_spill]]  ;;  %s4374_s26 = sld [smem:[#allocation38_spill]] }
 0x69a   : > { %s4375_s17 = smov %s3422_s18  ;;  %s4376_s18 = smov %s3426_s19 }
 0x69b   : > { %s4377_s19 = smov %s3859_s5  ;;  %s4378_s20 = smov %s3434_s21 }
 0x69c   : > { %s4379_s21 = smov %s3438_s22  ;;  %s4380_s22 = smov %s3779_s25 }
 0x69d   : > { %s4381_s24 = smov %s3462_s0  ;;  %s4383_s0 = smov %s4397_s15 }
 0x69e   :  { %41 = sbr.rel (!%p4219_p8) target bundleno = 46 (0x2e), region = 151 }
 0x69f   : > { %s4382_s25 = smov %s4373_s8 }
 0x6a5   :  { %2215 = vsyncpa [#allocation11], 1 }
 0x6a6   :  { %2217 = vsyncpa [#allocation11 + $0x1], 1 }
 0x6a7   :  { %2218 = vsyncpa [#allocation13], 1 }
 0x6a8   :  { %2220 = vsyncpa [#allocation13 + $0x1], 1 }
 0x6a9   :  { %2221 = vsyncpa [#allocation16], 1 }

</bundles_post_ra>
